<compile_context>
chip_gen: v7x
topology: tpu7x:2x2x1
jax: 0.10.0
libtpu: 0.0.40
codegen_flags: <defaults>
</compile_context>

<pallas_src>
import math

import jax
import jax.numpy as jnp
from jax.experimental import pallas as pl
from jax.experimental.pallas import tpu as pltpu


def _gelu_exact_f32(h):
    # Exact (erf) GELU in f32 -- matches torch.nn.GELU() default.
    inv_sqrt2 = jnp.float32(1.0 / math.sqrt(2.0))
    return 0.5 * h * (1.0 + jax.lax.erf(h * inv_sqrt2))


def _ffn_kernel_resident(x_ref, w1_ref, b1_ref, w2_ref, b2_ref, o_ref):
    # Full d_ff resident: one shot per row tile, write output directly.
    # x_ref : (tm, d_model)   w1_ref: (d_model, d_ff)   b1_ref: (1, d_ff)
    # w2_ref: (d_ff, d_model) b2_ref: (1, d_model)      o_ref : (tm, d_model)
    h = jnp.dot(x_ref[...], w1_ref[...], preferred_element_type=jnp.float32)
    h = _gelu_exact_f32(h + b1_ref[...].astype(jnp.float32))
    # Dropout: inference mode == identity.
    # TODO(synk): training-mode stochastic dropout (pltpu.prng_random_bits).
    y = jnp.dot(h.astype(w2_ref.dtype), w2_ref[...], preferred_element_type=jnp.float32)
    o_ref[...] = (y + b2_ref[...].astype(jnp.float32)).astype(o_ref.dtype)


def _ffn_kernel_blocked(x_ref, w1_ref, b1_ref, w2_ref, b2_ref, o_ref, acc_ref):
    # d_ff-blocked: accumulate partial second matmul in f32 scratch.
    # x_ref : (tm, d_model)   w1_ref: (d_model, tff)   b1_ref: (1, tff)
    # w2_ref: (tff, d_model)  b2_ref: (1, d_model)
    # o_ref : (tm, d_model)   acc_ref: (tm, d_model) f32 scratch
    ff = pl.program_id(1)

    @pl.when(ff == 0)
    def _():
        acc_ref[...] = jnp.zeros_like(acc_ref)

    h = jnp.dot(x_ref[...], w1_ref[...], preferred_element_type=jnp.float32)
    h = _gelu_exact_f32(h + b1_ref[...].astype(jnp.float32))
    # Dropout: inference mode == identity.

    acc_ref[...] += jnp.dot(
        h.astype(w2_ref.dtype), w2_ref[...], preferred_element_type=jnp.float32
    )

    @pl.when(ff == pl.num_programs(1) - 1)
    def _():
        o_ref[...] = (acc_ref[...] + b2_ref[...].astype(jnp.float32)).astype(o_ref.dtype)


def positionwise_ffn(x, w1, b1, w2, b2, *, tm=256, tff=None, vmem_limit_bytes=None):
    """x: [batch, seq, d_model]; w1: [d_model, d_ff]; w2: [d_ff, d_model].

    tm : token-row tile (multiple of 8; ~256 feeds the 256x256 MXU on v6e/v7x,
         use a multiple of 128 on v5e).
    tff: d_ff block size (multiple of 128).  None -> full d_ff resident
         (fine for v5e/v6e 128 MiB VMEM); pass e.g. 512/1024 on v7x (64 MiB).
    """
    batch, seq, d_model = x.shape
    d_ff = w1.shape[1]
    assert w1.shape == (d_model, d_ff) and w2.shape == (d_ff, d_model)
    assert b1.shape == (d_ff,) and b2.shape == (d_model,)
    # Lane-dense guards: keeps loads/stores as full-lane vst/vld.
    assert d_model % 128 == 0, "d_model must be a multiple of 128"
    assert d_ff % 128 == 0, "d_ff must be a multiple of 128"

    if tff is None:
        tff = d_ff
    assert d_ff % tff == 0 and tff % 128 == 0, "tff must be a 128-multiple dividing d_ff"
    n_ff = d_ff // tff

    M = batch * seq
    # Row tile: as large as requested but no larger than M; multiple of 8 sublanes.
    tm = max(8, min(tm, M))
    tm = (tm // 8) * 8
    n_m = pl.cdiv(M, tm)
    M_pad = n_m * tm

    x2d = x.reshape(M, d_model)
    if M_pad != M:
        x2d = jnp.pad(x2d, ((0, M_pad - M), (0, 0)))

    b1_2d = b1.reshape(1, d_ff)
    b2_2d = b2.reshape(1, d_model)

    # Constant-index weights/biases are single-buffered (never re-fetched);
    # d_ff-blocked weights keep double-buffering so their DMA overlaps compute.
    w_buf = pl.Buffered(1) if n_ff == 1 else pl.Buffered(2)
    const_buf = pl.Buffered(1)

    if vmem_limit_bytes is None:
        wsize = w1.dtype.itemsize
        xsize = x.dtype.itemsize
        w_bufs = 1 if n_ff == 1 else 2
        weights = w_bufs * (d_model * tff + tff * d_model) * wsize
        biases = 2 * 8 * (tff + d_model) * wsize          # sublane-padded (8, lanes)
        streams = 2 * 2 * tm * d_model * xsize            # x + out, double-buffered
        acc = 0 if n_ff == 1 else tm * d_model * 4        # f32 accumulator scratch
        inter = tm * tff * 4                              # f32 GELU intermediate
        vmem_limit_bytes = int(1.5 * (weights + biases + streams + acc + inter))
        vmem_limit_bytes = max(vmem_limit_bytes + (2 << 20), 8 << 20)
        vmem_limit_bytes = min(vmem_limit_bytes, 96 << 20)

    if n_ff == 1:
        grid = (n_m,)
        in_specs = [
            pl.BlockSpec((tm, d_model), lambda i: (i, 0)),
            pl.BlockSpec((d_model, d_ff), lambda i: (0, 0), pipeline_mode=const_buf),
            pl.BlockSpec((1, d_ff), lambda i: (0, 0), pipeline_mode=const_buf),
            pl.BlockSpec((d_ff, d_model), lambda i: (0, 0), pipeline_mode=const_buf),
            pl.BlockSpec((1, d_model), lambda i: (0, 0), pipeline_mode=const_buf),
        ]
        out_spec = pl.BlockSpec((tm, d_model), lambda i: (i, 0))
        scratch = []
        kernel = _ffn_kernel_resident
        dim_sem = ("parallel",)
    else:
        grid = (n_m, n_ff)
        in_specs = [
            # x tile: constant across the ff axis -> fetched once per row tile.
            pl.BlockSpec((tm, d_model), lambda i, f: (i, 0)),
            pl.BlockSpec((d_model, tff), lambda i, f: (0, f), pipeline_mode=w_buf),
            pl.BlockSpec((1, tff), lambda i, f: (0, f), pipeline_mode=w_buf),
            pl.BlockSpec((tff, d_model), lambda i, f: (f, 0), pipeline_mode=w_buf),
            pl.BlockSpec((1, d_model), lambda i, f: (0, 0), pipeline_mode=const_buf),
        ]
        out_spec = pl.BlockSpec((tm, d_model), lambda i, f: (i, 0))
        scratch = [pltpu.VMEM((tm, d_model), jnp.float32)]
        kernel = _ffn_kernel_blocked
        dim_sem = ("parallel", "arbitrary")

    out2d = pl.pallas_call(
        kernel,
        out_shape=jax.ShapeDtypeStruct((M_pad, d_model), x.dtype),
        grid_spec=pltpu.PrefetchScalarGridSpec(
            num_scalar_prefetch=0,
            grid=grid,
            in_specs=in_specs,
            out_specs=out_spec,
            scratch_shapes=scratch,
        ),
        compiler_params=pltpu.CompilerParams(
            dimension_semantics=dim_sem,
            vmem_limit_bytes=vmem_limit_bytes,
        ),
    )(x2d, w1, b1_2d, w2, b2_2d)

    if M_pad != M:
        out2d = out2d[:M]
    return out2d.reshape(batch, seq, d_model)


def init_params(key, d_model, d_ff, dtype=jnp.float32):
    """Deterministic nn.Linear-style init (uniform +/- 1/sqrt(fan_in)).

    Stored pre-transposed relative to PyTorch: w1 is [d_model, d_ff] so the
    kernel computes x @ w1 (== x @ W1_pt.T)."""
    k1, k2, k3, k4 = jax.random.split(key, 4)
    lim1 = 1.0 / math.sqrt(d_model)
    lim2 = 1.0 / math.sqrt(d_ff)
    w1 = jax.random.uniform(k1, (d_model, d_ff), dtype, -lim1, lim1)
    b1 = jax.random.uniform(k2, (d_ff,), dtype, -lim1, lim1)
    w2 = jax.random.uniform(k3, (d_ff, d_model), dtype, -lim2, lim2)
    b2 = jax.random.uniform(k4, (d_model,), dtype, -lim2, lim2)
    return w1, b1, w2, b2


if __name__ == "__main__":
    # Small, lane-aligned shapes (d_model/d_ff multiples of 128).
    d_model, d_ff = 128, 512
    batch, seq = 2, 64

    key = jax.random.PRNGKey(0)
    kx, kp = jax.random.split(key)
    x = jax.random.normal(kx, (batch, seq, d_model), jnp.float32)
    w1, b1, w2, b2 = init_params(kp, d_model, d_ff)

    # Plain-JAX reference (exact-erf GELU, dropout in eval mode).
    hi = jax.lax.Precision.HIGHEST
    h_ref = jnp.dot(x, w1, precision=hi) + b1
    h_ref = 0.5 * h_ref * (1.0 + jax.lax.erf(h_ref / jnp.sqrt(2.0)))
    ref = jnp.dot(h_ref, w2, precision=hi) + b2

    # 1) Fully-resident fast path (tff = d_ff) -> single-shot kernel.
    out_res = positionwise_ffn(x, w1, b1, w2, b2, tm=256)
    out_res = jax.block_until_ready(out_res)
    assert out_res.shape == (batch, seq, d_model)
    assert jnp.allclose(out_res, ref, atol=5e-4, rtol=5e-4), (
        float(jnp.max(jnp.abs(out_res - ref)))
    )

    # 2) d_ff-blocked accumulator path (v7x-friendly), with non-dividing tm to
    #    exercise the row-padding path as well.
    out_blk = positionwise_ffn(x, w1, b1, w2, b2, tm=96, tff=256)
    out_blk = jax.block_until_ready(out_blk)
    assert out_blk.shape == (batch, seq, d_model)
    assert jnp.allclose(out_blk, ref, atol=5e-4, rtol=5e-4), (
        float(jnp.max(jnp.abs(out_blk - ref)))
    )

    print("KERNEL_OK")
</pallas_src>

<mosaic_0001>
module attributes {stable_mosaic.version = 11 : i64} {
  func.func @_ffn_kernel_resident(%arg0: i32, %arg1: memref<128x128xf32, #tpu.memory_space<vmem>>, %arg2: memref<128x512xf32, #tpu.memory_space<vmem>>, %arg3: memref<1x512xf32, #tpu.memory_space<vmem>>, %arg4: memref<512x128xf32, #tpu.memory_space<vmem>>, %arg5: memref<1x128xf32, #tpu.memory_space<vmem>>, %arg6: memref<128x128xf32, #tpu.memory_space<vmem>>) attributes {dimension_semantics = [#tpu.dimension_semantics<parallel>], iteration_bounds = array<i64: 1>, scalar_prefetch = 0 : i64, scratch_operands = 0 : i64, tpu.core_type = #tpu.core_type<tc>, window_params = [{transform_indices = @transform_0, window_bounds = array<i64: 128, 128>}, {pipeline_mode = #tpu.pipeline_mode<synchronous>, transform_indices = @transform_1, window_bounds = array<i64: 128, 512>}, {pipeline_mode = #tpu.pipeline_mode<synchronous>, transform_indices = @transform_2, window_bounds = array<i64: 1, 512>}, {pipeline_mode = #tpu.pipeline_mode<synchronous>, transform_indices = @transform_3, window_bounds = array<i64: 512, 128>}, {pipeline_mode = #tpu.pipeline_mode<synchronous>, transform_indices = @transform_4, window_bounds = array<i64: 1, 128>}, {transform_indices = @transform_5, window_bounds = array<i64: 128, 128>}]} {
    %c0 = arith.constant 0 : index
    %c0_0 = arith.constant 0 : index
    %0 = vector.load %arg1[%c0, %c0_0] : memref<128x128xf32, #tpu.memory_space<vmem>>, vector<128x128xf32>
    %c0_1 = arith.constant 0 : index
    %c0_2 = arith.constant 0 : index
    %1 = vector.load %arg2[%c0_1, %c0_2] : memref<128x512xf32, #tpu.memory_space<vmem>>, vector<128x512xf32>
    %cst = arith.constant dense<0.000000e+00> : vector<128x512xf32>
    %2 = tpu.matmul %0, %1, %cst {dimension_numbers = #tpu.dot_dimension_numbers<[1], [0], [0], [1], [0, 0, 1, 1], [], []>} : vector<128x128xf32>, vector<128x512xf32>, vector<128x512xf32> -> vector<128x512xf32>
    %c0_3 = arith.constant 0 : index
    %c0_4 = arith.constant 0 : index
    %3 = vector.load %arg3[%c0_3, %c0_4] : memref<1x512xf32, #tpu.memory_space<vmem>>, vector<1x512xf32>
    %4 = vector.broadcast %3 : vector<1x512xf32> to vector<128x512xf32>
    %5 = arith.addf %2, %4 : vector<128x512xf32>
    %cst_5 = arith.constant 5.000000e-01 : f32
    %6 = vector.broadcast %cst_5 : f32 to vector<128x512xf32>
    %7 = arith.mulf %6, %5 : vector<128x512xf32>
    %cst_6 = arith.constant 0.707106769 : f32
    %8 = vector.broadcast %cst_6 : f32 to vector<128x512xf32>
    %9 = arith.mulf %5, %8 : vector<128x512xf32>
    %10 = math.erf %9 : vector<128x512xf32>
    %cst_7 = arith.constant 1.000000e+00 : f32
    %11 = vector.broadcast %cst_7 : f32 to vector<128x512xf32>
    %12 = arith.addf %11, %10 : vector<128x512xf32>
    %13 = arith.mulf %7, %12 : vector<128x512xf32>
    %c0_8 = arith.constant 0 : index
    %c0_9 = arith.constant 0 : index
    %14 = vector.load %arg4[%c0_8, %c0_9] : memref<512x128xf32, #tpu.memory_space<vmem>>, vector<512x128xf32>
    %cst_10 = arith.constant dense<0.000000e+00> : vector<128x128xf32>
    %15 = tpu.matmul %13, %14, %cst_10 {dimension_numbers = #tpu.dot_dimension_numbers<[1], [0], [0], [1], [0, 0, 1, 1], [], []>} : vector<128x512xf32>, vector<512x128xf32>, vector<128x128xf32> -> vector<128x128xf32>
    %c0_11 = arith.constant 0 : index
    %c0_12 = arith.constant 0 : index
    %16 = vector.load %arg5[%c0_11, %c0_12] : memref<1x128xf32, #tpu.memory_space<vmem>>, vector<1x128xf32>
    %17 = vector.broadcast %16 : vector<1x128xf32> to vector<128x128xf32>
    %18 = arith.addf %15, %17 : vector<128x128xf32>
    %c0_13 = arith.constant 0 : index
    %c0_14 = arith.constant 0 : index
    %19 = vector.load %arg6[%c0_13, %c0_14] : memref<128x128xf32, #tpu.memory_space<vmem>>, vector<128x128xf32>
    tpu.vector_store %arg6[%c0_13, %c0_14], %18 {strides = array<i32>} : memref<128x128xf32, #tpu.memory_space<vmem>>, vector<128x128xf32>,
    return
  }
  func.func @transform_0(%arg0: i32) -> (i32, i32) {
    %c0_i32 = arith.constant 0 : i32
    %c0_i32_0 = arith.constant 0 : i32
    return %arg0, %c0_i32 : i32, i32
  }
  func.func @transform_1(%arg0: i32) -> (i32, i32) {
    %c0_i32 = arith.constant 0 : i32
    %c0_i32_0 = arith.constant 0 : i32
    %c0_i32_1 = arith.constant 0 : i32
    return %c0_i32, %c0_i32_0 : i32, i32
  }
  func.func @transform_2(%arg0: i32) -> (i32, i32) {
    %c0_i32 = arith.constant 0 : i32
    %c0_i32_0 = arith.constant 0 : i32
    %c0_i32_1 = arith.constant 0 : i32
    return %c0_i32, %c0_i32_0 : i32, i32
  }
  func.func @transform_3(%arg0: i32) -> (i32, i32) {
    %c0_i32 = arith.constant 0 : i32
    %c0_i32_0 = arith.constant 0 : i32
    %c0_i32_1 = arith.constant 0 : i32
    return %c0_i32, %c0_i32_0 : i32, i32
  }
  func.func @transform_4(%arg0: i32) -> (i32, i32) {
    %c0_i32 = arith.constant 0 : i32
    %c0_i32_0 = arith.constant 0 : i32
    %c0_i32_1 = arith.constant 0 : i32
    return %c0_i32, %c0_i32_0 : i32, i32
  }
  func.func @transform_5(%arg0: i32) -> (i32, i32) {
    %c0_i32 = arith.constant 0 : i32
    %c0_i32_0 = arith.constant 0 : i32
    return %arg0, %c0_i32 : i32, i32
  }
}

</mosaic_0001>

<bundles_post_ra>
// kernel: tpu_custom_call.1
= control target key start
LH: loop header
LB: loop body
LE: loop exit
PB: predicated region body
PF: predicated region fallthrough
CT: control target
= control target key end

     0   :  { %10 = vsyncpa [#allocation3], 0  ;;  %s2304_s0 = inlined_call_operand.hbm [shape: f32[128,128], index: 0, kind: input, shape index: {}]   ;;  %s2305_s1 = inlined_call_operand.hbm [shape: f32[128,512], index: 1, kind: input, shape index: {}]   ;;  %s2306_s2 = inlined_call_operand.vmem [shape: f32[1,512], index: 2, kind: input, shape index: {}]   ;;  %s2307_s3 = inlined_call_operand.hbm [shape: f32[512,128], index: 3, kind: input, shape index: {}]   ;;  %s2308_s4 = inlined_call_operand.vmem [shape: f32[1,128], index: 4, kind: input, shape index: {}]   ;;  %s2309_s5 = inlined_call_operand.hbm [shape: f32[128,128], index: 5, kind: output, shape index: {}]  }
   0x1   :  { %11 = vsyncpa [#allocation6], 0 }
   0x2   :  { %12 = vsyncpa [#allocation4], 0  ;;  %s1721_s18 = smov [#allocation5]   ;;  %s1627_s22 = scalar_lea.hbm %s2305_s1, 8192 }
   0x3   :  { %s30_s19 = sshll.u32 %s1721_s18, 4  ;;  %p1628_p0 = scmp.ne.s32.totalorder %s2305_s1, %s1627_s22  ;;  %s31_s19 = int_to_ptr.vmem [resolvable:$true] %s30_s19 }
   0x4   :  { %p1631_p1 = scmp.lt.u32.totalorder %s1627_s22, %s2305_s1 }
   0x6   :  { %p1633_p2 = pnand %p1631_p1, %p1628_p0 }
   0x8   :  { %1636 = shalt.err (!%p1633_p2)
}
   0x9   :  { %s1637_s27 = scalar_lea.vmem %s31_s19, 8192  ;;  %p1642_p4 = scmp.lt.s32.totalorder %s31_s19, %s31_s19 }
   0xa   :  { %p1638_p3 = scmp.ne.s32.totalorder %s31_s19, %s1637_s27  ;;  %p1643_p5 = scmp.lt.s32.totalorder %s1637_s27, %s1637_s27 }
   0xc   :  { %p1644_p6 = por %p1643_p5, %p1642_p4 }
   0xe   :  { %p1645_p7 = pnand %p1644_p6, %p1638_p3 }
  0x10   :  { %1648 = shalt.err (!%p1645_p7)
}
  0x11   :  { %s1722_s28 = smov 512   ;;  %s1723_s29 = smov 32  }
  0x12   :  { %36 = dma.hbm_to_vmem [thread:$0]  %s2305_s1, 8192, %s31_s19, [#allocation6], %s1722_s28, %s1722_s28, %s1723_s29  }
  0x13   :  { %s1724_s7 = smov [#allocation2]   ;;  %s1649_s11 = scalar_lea.hbm %s2304_s0, 2048 }
  0x14   :  { %s18_s8 = sshll.u32 %s1724_s7, 4  ;;  %p1650_p8 = scmp.ne.s32.totalorder %s2304_s0, %s1649_s11  ;;  %s19_s8 = int_to_ptr.vmem [resolvable:$true] %s18_s8 }
  0x15   :  { %p1653_p9 = scmp.lt.u32.totalorder %s1649_s11, %s2304_s0 }
  0x17   :  { %p1655_p10 = pnand %p1653_p9, %p1650_p8 }
  0x19   :  { %1658 = shalt.err (!%p1655_p10)
}
  0x1a   :  { %s1659_s16 = scalar_lea.vmem %s19_s8, 2048  ;;  %p1664_p12 = scmp.lt.s32.totalorder %s19_s8, %s19_s8 }
  0x1b   :  { %p1660_p11 = scmp.ne.s32.totalorder %s19_s8, %s1659_s16  ;;  %p1665_p13 = scmp.lt.s32.totalorder %s1659_s16, %s1659_s16 }
  0x1d   :  { %p1666_p0 = por %p1665_p13, %p1664_p12 }
  0x1f   :  { %p1667_p1 = pnand %p1666_p0, %p1660_p11 }
  0x21   :  { %1670 = shalt.err (!%p1667_p1)
}
  0x22   :  { %s1725_s1 = smov 128   ;;  %s1726_s17 = smov 8  }
  0x23   :  { %24 = dma.hbm_to_vmem [thread:$0]  %s2304_s0, 2048, %s19_s8, [#allocation3], %s1725_s1, %s1725_s1, %s1726_s17  }
  0x24   :  { %s1727_s20 = smov [#allocation7]   ;;  %s1671_s24 = scalar_lea.hbm %s2307_s3, 8192 }
  0x25   :  { %s44_s21 = sshll.u32 %s1727_s20, 4  ;;  %p1672_p2 = scmp.ne.s32.totalorder %s2307_s3, %s1671_s24  ;;  %s45_s21 = int_to_ptr.vmem [resolvable:$true] %s44_s21 }
  0x26   :  { %p1675_p3 = scmp.lt.u32.totalorder %s1671_s24, %s2307_s3 }
  0x28   :  { %p1677_p4 = pnand %p1675_p3, %p1672_p2 }
  0x2a   :  { %1680 = shalt.err (!%p1677_p4)
}
  0x2b   :  { %s1681_s29 = scalar_lea.vmem %s45_s21, 8192  ;;  %p1686_p6 = scmp.lt.s32.totalorder %s45_s21, %s45_s21 }
  0x2c   :  { %p1682_p5 = scmp.ne.s32.totalorder %s45_s21, %s1681_s29  ;;  %p1687_p7 = scmp.lt.s32.totalorder %s1681_s29, %s1681_s29 }
  0x2e   :  { %p1688_p8 = por %p1687_p7, %p1686_p6 }
  0x30   :  { %p1689_p9 = pnand %p1688_p8, %p1682_p5 }
  0x32   :  { %1692 = shalt.err (!%p1689_p9)
}
  0x33   :  { %50 = dma.hbm_to_vmem [thread:$0]  %s2307_s3, 8192, %s45_s21, [#allocation6], %s1725_s1, %s1725_s1, %s1726_s17  }
  0x34   :  { %1715 = dma.done.wait [#allocation3], 2048  }
  0x35   :  { %1716 = vsyncadd [#allocation3], 4294965248 }
  0x36   :  { %1717 = dma.done.wait [#allocation6], 16384  }
  0x37   :  { %1718 = vsyncadd [#allocation6], 4294950912  ;;  %v1728_v0 = vmov 0.0   ;;  %v79_v1 = vld [vmem:[#allocation5 + $0x8] sm:$0xff]  ;;  %v81_v3 = vld [vmem:[#allocation5 + $0x18] sm:$0xff] }
  0x38   :  { %228 = vmatprep.mubr.f32.mxu0 %v1728_v0  ;;  %389 = vmatprep.mubr.f32.mxu1 %v1728_v0  ;;  %v83_v2 = vld [vmem:[#allocation5 + $0x28] sm:$0xff]  ;;  %v85_v5 = vld [vmem:[#allocation5 + $0x38] sm:$0xff]  ;;  %v78_v6 = vld [vmem:[#allocation5] sm:$0xff] }
  0x39   :  { %v1362_v4 = vpack.c.bf16 %v83_v2, %v79_v1  ;;  %v82_v7 = vld [vmem:[#allocation5 + $0x20] sm:$0xff]  ;;  %v1394_v8 = vpack.c.bf16 %v85_v5, %v81_v3  ;;  %v80_v10 = vld [vmem:[#allocation5 + $0x10] sm:$0xff]  ;;  %v87_v12 = vld [vmem:[#allocation5 + $0x48] sm:$0xff] }
  0x3a   :  { %v1364_v9 = vpack.c.bf16 %v82_v7, %v78_v6  ;;  %v84_v11 = vld [vmem:[#allocation5 + $0x30] sm:$0xff]  ;;  %v91_v14 = vld [vmem:[#allocation5 + $0x68] sm:$0xff]  ;;  %v89_v15 = vld [vmem:[#allocation5 + $0x58] sm:$0xff] }
  0x3b   :  { %1363 = vmatprep.subr.bf16.mxu0 %v1362_v4  ;;  %v1396_v13 = vpack.c.bf16 %v84_v11, %v80_v10  ;;  %v93_v16 = vld [vmem:[#allocation5 + $0x78] sm:$0xff]  ;;  %1395 = vmatprep.subr.bf16.mxu1 %v1394_v8  ;;  %v1366_v17 = vpack.c.bf16 %v91_v14, %v87_v12  ;;  %v86_v19 = vld [vmem:[#allocation5 + $0x40] sm:$0xff]  ;;  %v88_v21 = vld [vmem:[#allocation5 + $0x50] sm:$0xff] }
  0x3c   :  { %1365 = vmatpush1.bf16.msra.mxu0 %v1364_v9  ;;  %v1398_v18 = vpack.c.bf16 %v93_v16, %v89_v15  ;;  %v90_v20 = vld [vmem:[#allocation5 + $0x60] sm:$0xff]  ;;  %v92_v23 = vld [vmem:[#allocation5 + $0x70] sm:$0xff]  ;;  %v95_v24 = vld [vmem:[#allocation5 + $0x88] sm:$0xff] }
  0x3d   :  { %1397 = vmatpush1.bf16.msra.mxu1 %v1396_v13  ;;  %v1368_v22 = vpack.c.bf16 %v90_v20, %v86_v19  ;;  %v99_v25 = vld [vmem:[#allocation5 + $0xa8] sm:$0xff]  ;;  %1367 = vmatprep.subr.bf16.mxu0 %v1366_v17  ;;  %v1400_v26 = vpack.c.bf16 %v92_v23, %v88_v21  ;;  %v97_v28 = vld [vmem:[#allocation5 + $0x98] sm:$0xff]  ;;  %v94_v30 = vld [vmem:[#allocation5 + $0x80] sm:$0xff] }
  0x3e   :  { %1399 = vmatprep.subr.bf16.mxu1 %v1398_v18  ;;  %v1370_v27 = vpack.c.bf16 %v99_v25, %v95_v24  ;;  %v101_v29 = vld [vmem:[#allocation5 + $0xb8] sm:$0xff]  ;;  %v98_v32 = vld [vmem:[#allocation5 + $0xa0] sm:$0xff]  ;;  %v96_v33 = vld [vmem:[#allocation5 + $0x90] sm:$0xff] }
  0x3f   :  { %v1402_v31 = vpack.c.bf16 %v101_v29, %v97_v28  ;;  %v100_v34 = vld [vmem:[#allocation5 + $0xb0] sm:$0xff]  ;;  %v1372_v35 = vpack.c.bf16 %v98_v32, %v94_v30  ;;  %v103_v36 = vld [vmem:[#allocation5 + $0xc8] sm:$0xff]  ;;  %v105_v38 = vld [vmem:[#allocation5 + $0xd8] sm:$0xff] }
  0x40   :  { %1369 = vmatpush1.bf16.msra.mxu0 %v1368_v22  ;;  %v107_v37 = vld [vmem:[#allocation5 + $0xe8] sm:$0xff]  ;;  %v1404_v39 = vpack.c.bf16 %v100_v34, %v96_v33  ;;  %v109_v41 = vld [vmem:[#allocation5 + $0xf8] sm:$0xff]  ;;  %v102_v42 = vld [vmem:[#allocation5 + $0xc0] sm:$0xff] }
  0x41   :  { %1401 = vmatpush1.bf16.msra.mxu1 %v1400_v26  ;;  %1371 = vmatprep.subr.bf16.mxu0 %v1370_v27  ;;  %v1374_v40 = vpack.c.bf16 %v107_v37, %v103_v36  ;;  %v106_v43 = vld [vmem:[#allocation5 + $0xe0] sm:$0xff]  ;;  %v1406_v44 = vpack.c.bf16 %v109_v41, %v105_v38  ;;  %v104_v45 = vld [vmem:[#allocation5 + $0xd0] sm:$0xff]  ;;  %v111_v47 = vld [vmem:[#allocation5 + $0x108] sm:$0xff] }
  0x42   :  { %1403 = vmatprep.subr.bf16.mxu1 %v1402_v31  ;;  %v108_v46 = vld [vmem:[#allocation5 + $0xf0] sm:$0xff]  ;;  %v115_v48 = vld [vmem:[#allocation5 + $0x128] sm:$0xff]  ;;  %v113_v49 = vld [vmem:[#allocation5 + $0x118] sm:$0xff]  ;;  %v1376_v51 = vpack.c.bf16 %v106_v43, %v102_v42 }
  0x43   :  { %v117_v50 = vld [vmem:[#allocation5 + $0x138] sm:$0xff]  ;;  %v1408_v52 = vpack.c.bf16 %v108_v46, %v104_v45  ;;  %v1378_v53 = vpack.c.bf16 %v115_v48, %v111_v47  ;;  %v110_v54 = vld [vmem:[#allocation5 + $0x100] sm:$0xff]  ;;  %v112_v56 = vld [vmem:[#allocation5 + $0x110] sm:$0xff] }
  0x44   :  { %1373 = vmatpush1.bf16.msra.mxu0 %v1372_v35  ;;  %v114_v55 = vld [vmem:[#allocation5 + $0x120] sm:$0xff]  ;;  %v1410_v57 = vpack.c.bf16 %v117_v50, %v113_v49  ;;  %v116_v58 = vld [vmem:[#allocation5 + $0x130] sm:$0xff]  ;;  %v119_v59 = vld [vmem:[#allocation5 + $0x148] sm:$0xff] }
  0x45   :  { %1405 = vmatpush1.bf16.msra.mxu1 %v1404_v39  ;;  %1375 = vmatprep.subr.bf16.mxu0 %v1374_v40  ;;  %v123_v60 = vld [vmem:[#allocation5 + $0x168] sm:$0xff]  ;;  %v121_v61 = vld [vmem:[#allocation5 + $0x158] sm:$0xff]  ;;  %v1380_v63 = vpack.c.bf16 %v114_v55, %v110_v54  ;;  %v1412_v1 = vpack.c.bf16 %v116_v58, %v112_v56  ;;  %v118_v3 = vld [vmem:[#allocation5 + $0x140] sm:$0xff] }
  0x46   :  { %1407 = vmatprep.subr.bf16.mxu1 %v1406_v44  ;;  %v125_v62 = vld [vmem:[#allocation5 + $0x178] sm:$0xff]  ;;  %v1382_v2 = vpack.c.bf16 %v123_v60, %v119_v59  ;;  %v122_v4 = vld [vmem:[#allocation5 + $0x160] sm:$0xff]  ;;  %v120_v5 = vld [vmem:[#allocation5 + $0x150] sm:$0xff] }
  0x47   :  { %v1414_v6 = vpack.c.bf16 %v125_v62, %v121_v61  ;;  %v124_v7 = vld [vmem:[#allocation5 + $0x170] sm:$0xff]  ;;  %v127_v8 = vld [vmem:[#allocation5 + $0x188] sm:$0xff]  ;;  %v129_v10 = vld [vmem:[#allocation5 + $0x198] sm:$0xff]  ;;  %v1384_v12 = vpack.c.bf16 %v122_v4, %v118_v3 }
  0x48   :  { %1377 = vmatpush1.bf16.msra.mxu0 %v1376_v51  ;;  %v131_v9 = vld [vmem:[#allocation5 + $0x1a8] sm:$0xff]  ;;  %v133_v11 = vld [vmem:[#allocation5 + $0x1b8] sm:$0xff]  ;;  %v1416_v13 = vpack.c.bf16 %v124_v7, %v120_v5  ;;  %v126_v15 = vld [vmem:[#allocation5 + $0x180] sm:$0xff] }
  0x49   :  { %1409 = vmatpush1.bf16.msra.mxu1 %v1408_v52  ;;  %1379 = vmatprep.subr.bf16.mxu0 %v1378_v53  ;;  %v1386_v14 = vpack.c.bf16 %v131_v9, %v127_v8  ;;  %v130_v16 = vld [vmem:[#allocation5 + $0x1a0] sm:$0xff]  ;;  %v128_v17 = vld [vmem:[#allocation5 + $0x190] sm:$0xff]  ;;  %v1418_v18 = vpack.c.bf16 %v133_v11, %v129_v10  ;;  %v135_v20 = vld [vmem:[#allocation5 + $0x1c8] sm:$0xff] }
  0x4a   :  { %1411 = vmatprep.subr.bf16.mxu1 %v1410_v57  ;;  %v132_v19 = vld [vmem:[#allocation5 + $0x1b0] sm:$0xff]  ;;  %v139_v21 = vld [vmem:[#allocation5 + $0x1e8] sm:$0xff]  ;;  %v137_v22 = vld [vmem:[#allocation5 + $0x1d8] sm:$0xff]  ;;  %v1388_v24 = vpack.c.bf16 %v130_v16, %v126_v15 }
  0x4b   :  { %v141_v23 = vld [vmem:[#allocation5 + $0x1f8] sm:$0xff]  ;;  %v1420_v25 = vpack.c.bf16 %v132_v19, %v128_v17  ;;  %v1390_v26 = vpack.c.bf16 %v139_v21, %v135_v20  ;;  %v134_v27 = vld [vmem:[#allocation5 + $0x1c0] sm:$0xff]  ;;  %v136_v30 = vld [vmem:[#allocation5 + $0x1d0] sm:$0xff] }
  0x4c   :  { %1381 = vmatpush1.bf16.msra.mxu0 %v1380_v63  ;;  %v138_v28 = vld [vmem:[#allocation5 + $0x1e0] sm:$0xff]  ;;  %v1422_v29 = vpack.c.bf16 %v141_v23, %v137_v22  ;;  %v140_v31 = vld [vmem:[#allocation5 + $0x1f0] sm:$0xff]  ;;  %v823_v33 = vld [vmem:[#allocation7 + $0x88] sm:$0xff] }
  0x4d   :  { %1413 = vmatpush1.bf16.msra.mxu1 %v1412_v1  ;;  %1383 = vmatprep.subr.bf16.mxu0 %v1382_v2  ;;  %v822_v32 = vld [vmem:[#allocation7 + $0x80] sm:$0xff]  ;;  %v1392_v34 = vpack.c.bf16 %v138_v28, %v134_v27  ;;  %v855_v36 = vld [vmem:[#allocation7 + $0x188] sm:$0xff]  ;;  %v1424_v37 = vpack.c.bf16 %v140_v31, %v136_v30  ;;  %v824_v44 = vld [vmem:[#allocation7 + $0x90] sm:$0xff] }
  0x4e   :  { %1415 = vmatprep.subr.bf16.mxu1 %v1414_v6  ;;  %v854_v35 = vld [vmem:[#allocation7 + $0x180] sm:$0xff]  ;;  %v1426_v38 = vpack.c.bf16 %v823_v33, %v822_v32  ;;  %v807_v40 = vld [vmem:[#allocation7 + $0x8] sm:$0xff]  ;;  %v825_v45 = vld [vmem:[#allocation7 + $0x98] sm:$0xff] }
  0x4f   :  { %v806_v39 = vld [vmem:[#allocation7] sm:$0xff]  ;;  %v1458_v41 = vpack.c.bf16 %v855_v36, %v854_v35  ;;  %v839_v43 = vld [vmem:[#allocation7 + $0x108] sm:$0xff]  ;;  %v856_v47 = vld [vmem:[#allocation7 + $0x190] sm:$0xff]  ;;  %v1430_v51 = vpack.c.bf16 %v825_v45, %v824_v44 }
  0x50   :  { %1385 = vmatpush1.bf16.msra.mxu0 %v1384_v12  ;;  %v838_v42 = vld [vmem:[#allocation7 + $0x100] sm:$0xff]  ;;  %v857_v48 = vld [vmem:[#allocation7 + $0x198] sm:$0xff]  ;;  %v1428_v49 = vpack.c.bf16 %v807_v40, %v806_v39  ;;  %v808_v52 = vld [vmem:[#allocation7 + $0x10] sm:$0xff] }
  0x51   :  { %1417 = vmatpush1.bf16.msra.mxu1 %v1416_v13  ;;  %1387 = vmatprep.subr.bf16.mxu0 %v1386_v14  ;;  %v62_v46 = vld [vmem:[#allocation2] sm:$0xff]  ;;  %v1460_v50 = vpack.c.bf16 %v839_v43, %v838_v42  ;;  %v809_v53 = vld [vmem:[#allocation7 + $0x18] sm:$0xff]  ;;  %v840_v54 = vld [vmem:[#allocation7 + $0x110] sm:$0xff]  ;;  %v1462_v55 = vpack.c.bf16 %v857_v48, %v856_v47 }
  0x52   :  { %1419 = vmatprep.subr.bf16.mxu1 %v1418_v18  ;;  %v841_v56 = vld [vmem:[#allocation7 + $0x118] sm:$0xff]  ;;  %v826_v57 = vld [vmem:[#allocation7 + $0xa0] sm:$0xff]  ;;  %v827_v58 = vld [vmem:[#allocation7 + $0xa8] sm:$0xff]  ;;  %v1432_v62 = vpack.c.bf16 %v809_v53, %v808_v52 }
  0x53   :  { %v63_v59 = vld [vmem:[#allocation2 + $0x8] sm:$0xff]  ;;  %v858_v60 = vld [vmem:[#allocation7 + $0x1a0] sm:$0xff]  ;;  %v1464_v63 = vpack.c.bf16 %v841_v56, %v840_v54  ;;  %v1434_v1 = vpack.c.bf16 %v827_v58, %v826_v57  ;;  %v828_v7 = vld [vmem:[#allocation7 + $0xb0] sm:$0xff] }
  0x54   :  { %1389 = vmatpush1.bf16.msra.mxu0 %v1388_v24  ;;  %v859_v61 = vld [vmem:[#allocation7 + $0x1a8] sm:$0xff]  ;;  %v810_v2 = vld [vmem:[#allocation7 + $0x20] sm:$0xff]  ;;  %v829_v8 = vld [vmem:[#allocation7 + $0xb8] sm:$0xff] }
  0x55   :  { %1421 = vmatpush1.bf16.msra.mxu1 %v1420_v25  ;;  %1391 = vmatprep.subr.bf16.mxu0 %v1390_v26  ;;  %v811_v3 = vld [vmem:[#allocation7 + $0x28] sm:$0xff]  ;;  %v842_v4 = vld [vmem:[#allocation7 + $0x120] sm:$0xff]  ;;  %v1466_v5 = vpack.c.bf16 %v859_v61, %v858_v60  ;;  %v64_v9 = vld [vmem:[#allocation2 + $0x10] sm:$0xff]  ;;  %v1438_v14 = vpack.c.bf16 %v829_v8, %v828_v7 }
  0x56   :  { %1423 = vmatprep.subr.bf16.mxu1 %v1422_v29  ;;  %v843_v6 = vld [vmem:[#allocation7 + $0x128] sm:$0xff]  ;;  %v860_v10 = vld [vmem:[#allocation7 + $0x1b0] sm:$0xff]  ;;  %v861_v11 = vld [vmem:[#allocation7 + $0x1b8] sm:$0xff]  ;;  %v1436_v12 = vpack.c.bf16 %v811_v3, %v810_v2 }
  0x57   :  { %v1468_v13 = vpack.c.bf16 %v843_v6, %v842_v4  ;;  %v812_v15 = vld [vmem:[#allocation7 + $0x30] sm:$0xff]  ;;  %v813_v16 = vld [vmem:[#allocation7 + $0x38] sm:$0xff]  ;;  %v1470_v18 = vpack.c.bf16 %v861_v11, %v860_v10  ;;  %v830_v20 = vld [vmem:[#allocation7 + $0xc0] sm:$0xff] }
  0x58   :  { %1393 = vmatpush1.bf16.msra.mxu0 %v1392_v34  ;;  %v844_v17 = vld [vmem:[#allocation7 + $0x130] sm:$0xff]  ;;  %v845_v19 = vld [vmem:[#allocation7 + $0x138] sm:$0xff]  ;;  %v831_v21 = vld [vmem:[#allocation7 + $0xc8] sm:$0xff]  ;;  %v1440_v25 = vpack.c.bf16 %v813_v16, %v812_v15 }
  0x59   :  { %1425 = vmatpush1.bf16.msra.mxu1 %v1424_v37  ;;  %1427 = vmatprep.subr.bf16.mxu0 %v1426_v38  ;;  %v65_v22 = vld [vmem:[#allocation2 + $0x18] sm:$0xff]  ;;  %v862_v23 = vld [vmem:[#allocation7 + $0x1c0] sm:$0xff]  ;;  %v863_v24 = vld [vmem:[#allocation7 + $0x1c8] sm:$0xff]  ;;  %v1472_v26 = vpack.c.bf16 %v845_v19, %v844_v17  ;;  %v1442_v27 = vpack.c.bf16 %v831_v21, %v830_v20  ;;  %v144_v19 = vlaneseq }
  0x5a   :  { %1459 = vmatprep.subr.bf16.mxu1 %v1458_v41  ;;  %v814_v28 = vld [vmem:[#allocation7 + $0x40] sm:$0xff]  ;;  %v815_v29 = vld [vmem:[#allocation7 + $0x48] sm:$0xff]  ;;  %v1474_v31 = vpack.c.bf16 %v863_v24, %v862_v23  ;;  %v832_v33 = vld [vmem:[#allocation7 + $0xd0] sm:$0xff] }
  0x5b   :  { %229 = vmatmul.mubr.f32.vlgmr.msra.gmra.mrb[0].mxu0 %v62_v46  ;;  %v846_v30 = vld [vmem:[#allocation7 + $0x140] sm:$0xff]  ;;  %v847_v32 = vld [vmem:[#allocation7 + $0x148] sm:$0xff]  ;;  %v833_v34 = vld [vmem:[#allocation7 + $0xd8] sm:$0xff]  ;;  %v1444_v38 = vpack.c.bf16 %v815_v29, %v814_v28  ;;  %v145_v20 = vshrl.u32 %v144_v19, 7 }
  0x5c   :  { %390 = vmatmul.mubr.f32.vlgmr.msra.gmra.mrb[0].mxu1 %v62_v46  ;;  %234 = vmatprep.mubr.f32.mxu0 %v1728_v0  ;;  %v66_v35 = vld [vmem:[#allocation2 + $0x20] sm:$0xff]  ;;  %v864_v36 = vld [vmem:[#allocation7 + $0x1d0] sm:$0xff]  ;;  %v865_v37 = vld [vmem:[#allocation7 + $0x1d8] sm:$0xff]  ;;  %v1476_v39 = vpack.c.bf16 %v847_v32, %v846_v30  ;;  %v1446_v40 = vpack.c.bf16 %v833_v34, %v832_v33 }
  0x5d   :  { %395 = vmatprep.mubr.f32.mxu1 %v1728_v0  ;;  %1429 = vmatpush3.bf16.msra.mxu0 %v1428_v49  ;;  %v816_v41 = vld [vmem:[#allocation7 + $0x50] sm:$0xff]  ;;  %v817_v42 = vld [vmem:[#allocation7 + $0x58] sm:$0xff]  ;;  %v1478_v43 = vpack.c.bf16 %v865_v37, %v864_v36  ;;  %v67_v44 = vld [vmem:[#allocation2 + $0x28] sm:$0xff]  ;;  %v146_v21 = vsub.s32 0, %v145_v20  ;;  %v154_v23 = vsub.s32 2, %v145_v20  ;;  %v150_v24 = vsub.s32 1, %v145_v20 }
  0x5e   :  { %1461 = vmatpush3.bf16.msra.mxu1 %v1460_v50  ;;  %1431 = vmatprep.subr.bf16.mxu0 %v1430_v51  ;;  %v1448_v45 = vpack.c.bf16 %v817_v42, %v816_v41  ;;  %v68_v46 = vld [vmem:[#allocation2 + $0x30] sm:$0xff]  ;;  %v69_v47 = vld [vmem:[#allocation2 + $0x38] sm:$0xff]  ;;  %v70_v48 = vld [vmem:[#allocation2 + $0x40] sm:$0xff] }
  0x5f   :  { %235 = vmatmul.mubr.f32.gmra.mrb[2].mxu0 %v63_v59  ;;  %1463 = vmatprep.subr.bf16.mxu1 %v1462_v55  ;;  %v71_v49 = vld [vmem:[#allocation2 + $0x48] sm:$0xff]  ;;  %v72_v50 = vld [vmem:[#allocation2 + $0x50] sm:$0xff]  ;;  %v73_v51 = vld [vmem:[#allocation2 + $0x58] sm:$0xff] }
  0x60   :  { %396 = vmatmul.mubr.f32.gmra.mrb[2].mxu1 %v63_v59  ;;  %240 = vmatprep.mubr.f32.mxu0 %v1728_v0  ;;  %v74_v52 = vld [vmem:[#allocation2 + $0x60] sm:$0xff]  ;;  %v75_v53 = vld [vmem:[#allocation2 + $0x68] sm:$0xff]  ;;  %v76_v54 = vld [vmem:[#allocation2 + $0x70] sm:$0xff] }
  0x61   :  { %401 = vmatprep.mubr.f32.mxu1 %v1728_v0  ;;  %1433 = vmatpush3.bf16.msra.mxu0 %v1432_v62  ;;  %v77_v55 = vld [vmem:[#allocation2 + $0x78] sm:$0xff]  ;;  %v848_v56 = vld [vmem:[#allocation7 + $0x150] sm:$0xff]  ;;  %v834_v59 = vld [vmem:[#allocation7 + $0xe0] sm:$0xff] }
  0x62   :  { %1465 = vmatpush3.bf16.msra.mxu1 %v1464_v63  ;;  %1435 = vmatprep.subr.bf16.mxu0 %v1434_v1  ;;  %v849_v57 = vld [vmem:[#allocation7 + $0x158] sm:$0xff]  ;;  %v835_v60 = vld [vmem:[#allocation7 + $0xe8] sm:$0xff]  ;;  %v866_v61 = vld [vmem:[#allocation7 + $0x1e0] sm:$0xff] }
  0x63   :  { %241 = vmatmul.mubr.f32.gmra.mrb[4].mxu0 %v64_v9  ;;  %1467 = vmatprep.subr.bf16.mxu1 %v1466_v5  ;;  %v1480_v58 = vpack.c.bf16 %v849_v57, %v848_v56  ;;  %v1450_v62 = vpack.c.bf16 %v835_v60, %v834_v59  ;;  %v818_v63 = vld [vmem:[#allocation7 + $0x60] sm:$0xff]  ;;  %v819_v1 = vld [vmem:[#allocation7 + $0x68] sm:$0xff]  ;;  %v837_v8 = vld [vmem:[#allocation7 + $0xf8] sm:$0xff] }
  0x64   :  { %402 = vmatmul.mubr.f32.gmra.mrb[4].mxu1 %v64_v9  ;;  %246 = vmatprep.mubr.f32.mxu0 %v1728_v0  ;;  %v867_v2 = vld [vmem:[#allocation7 + $0x1e8] sm:$0xff]  ;;  %v1452_v3 = vpack.c.bf16 %v819_v1, %v818_v63  ;;  %v850_v5 = vld [vmem:[#allocation7 + $0x160] sm:$0xff]  ;;  %v868_v9 = vld [vmem:[#allocation7 + $0x1f0] sm:$0xff] }
  0x65   :  { %407 = vmatprep.mubr.f32.mxu1 %v1728_v0  ;;  %1437 = vmatpush3.bf16.msra.mxu0 %v1436_v12  ;;  %v1482_v4 = vpack.c.bf16 %v867_v2, %v866_v61  ;;  %v851_v6 = vld [vmem:[#allocation7 + $0x168] sm:$0xff]  ;;  %v820_v11 = vld [vmem:[#allocation7 + $0x70] sm:$0xff]  ;;  %v821_v12 = vld [vmem:[#allocation7 + $0x78] sm:$0xff] }
  0x66   :  { %1469 = vmatpush3.bf16.msra.mxu1 %v1468_v13  ;;  %1439 = vmatprep.subr.bf16.mxu0 %v1438_v14  ;;  %v1484_v7 = vpack.c.bf16 %v851_v6, %v850_v5  ;;  %v869_v13 = vld [vmem:[#allocation7 + $0x1f8] sm:$0xff]  ;;  %v1456_v14 = vpack.c.bf16 %v821_v12, %v820_v11  ;;  %v852_v16 = vld [vmem:[#allocation7 + $0x170] sm:$0xff] }
  0x67   :  { %247 = vmatmul.mubr.f32.gmra.mrb[6].mxu0 %v65_v22  ;;  %1471 = vmatprep.subr.bf16.mxu1 %v1470_v18  ;;  %v1486_v15 = vpack.c.bf16 %v869_v13, %v868_v9  ;;  %v853_v17 = vld [vmem:[#allocation7 + $0x178] sm:$0xff] }
  0x68   :  { %408 = vmatmul.mubr.f32.gmra.mrb[6].mxu1 %v65_v22  ;;  %252 = vmatprep.mubr.f32.mxu0 %v1728_v0  ;;  %v1488_v18 = vpack.c.bf16 %v853_v17, %v852_v16  ;;  %v142_v22 = vld [vmem:[%s2306_s2] sm:$0xf] }
  0x69   :  { %413 = vmatprep.mubr.f32.mxu1 %v1728_v0  ;;  %1441 = vmatpush3.bf16.msra.mxu0 %v1440_v25  ;;  %v1837_v25 = vrot.slane %v142_v22, %v146_v21  ;;  %v1841_v29 = vrot.slane %v142_v22, %v150_v24 }
  0x6a   :  { %1473 = vmatpush3.bf16.msra.mxu1 %v1472_v26  ;;  %1443 = vmatprep.subr.bf16.mxu0 %v1442_v27  ;;  %v158_v26 = vsub.s32 3, %v145_v20  ;;  %v1839_v27 = vrot.slane %v142_v22, %v154_v23 }
  0x6b   :  { %253 = vmatmul.mubr.f32.gmra.mrb[8].mxu0 %v66_v35  ;;  %1475 = vmatprep.subr.bf16.mxu1 %v1474_v31 }
  0x6c   :  { %414 = vmatmul.mubr.f32.gmra.mrb[8].mxu1 %v66_v35  ;;  %258 = vmatprep.mubr.f32.mxu0 %v1728_v0  ;;  %v1844_v33 = vrot.slane %v142_v22, %v158_v26 }
  0x6d   :  { %419 = vmatprep.mubr.f32.mxu1 %v1728_v0  ;;  %1445 = vmatpush3.bf16.msra.mxu0 %v1444_v38 }
  0x6e   :  { %1477 = vmatpush3.bf16.msra.mxu1 %v1476_v39  ;;  %1447 = vmatprep.subr.bf16.mxu0 %v1446_v40 }
  0x6f   :  { %259 = vmatmul.mubr.f32.gmra.mrb[10].mxu0 %v67_v44  ;;  %1479 = vmatprep.subr.bf16.mxu1 %v1478_v43 }
  0x70   :  { %420 = vmatmul.mubr.f32.gmra.mrb[10].mxu1 %v67_v44  ;;  %264 = vmatprep.mubr.f32.mxu0 %v1728_v0 }
  0x71   :  { %425 = vmatprep.mubr.f32.mxu1 %v1728_v0  ;;  %1449 = vmatpush3.bf16.msra.mxu0 %v1448_v45 }
  0x72   :  { %1481 = vmatpush3.bf16.msra.mxu1 %v1480_v58  ;;  %1451 = vmatprep.subr.bf16.mxu0 %v1450_v62 }
  0x73   :  { %265 = vmatmul.mubr.f32.gmra.mrb[12].mxu0 %v68_v46  ;;  %1483 = vmatprep.subr.bf16.mxu1 %v1482_v4 }
  0x74   :  { %426 = vmatmul.mubr.f32.gmra.mrb[12].mxu1 %v68_v46  ;;  %270 = vmatprep.mubr.f32.mxu0 %v1728_v0 }
  0x75   :  { %431 = vmatprep.mubr.f32.mxu1 %v1728_v0  ;;  %1453 = vmatpush3.bf16.msra.mxu0 %v1452_v3 }
  0x76   :  { %1485 = vmatpush3.bf16.msra.mxu1 %v1484_v7 }
  0x77   :  { %271 = vmatmul.mubr.f32.gmra.mrb[14].mxu0 %v69_v47  ;;  %1487 = vmatprep.subr.bf16.mxu1 %v1486_v15 }
  0x78   :  { %432 = vmatmul.mubr.f32.gmra.mrb[14].mxu1 %v69_v47  ;;  %276 = vmatprep.mubr.f32.mxu0 %v1728_v0 }
  0x79   :  { %437 = vmatprep.mubr.f32.mxu1 %v1728_v0 }
  0x7a   :  { %1489 = vmatpush3.bf16.msra.mxu1 %v1488_v18 }
  0x7b   :  { %277 = vmatmul.mubr.f32.gmra.mrb[16].mxu0 %v70_v48 }
  0x7c   :  { %438 = vmatmul.mubr.f32.gmra.mrb[16].mxu1 %v70_v48  ;;  %282 = vmatprep.mubr.f32.mxu0 %v1728_v0 }
  0x7d   :  { %443 = vmatprep.mubr.f32.mxu1 %v1728_v0 }
  0x7f   :  { %283 = vmatmul.mubr.f32.gmra.mrb[18].mxu0 %v71_v49 }
  0x80   :  { %444 = vmatmul.mubr.f32.gmra.mrb[18].mxu1 %v71_v49  ;;  %288 = vmatprep.mubr.f32.mxu0 %v1728_v0 }
  0x81   :  { %449 = vmatprep.mubr.f32.mxu1 %v1728_v0 }
  0x83   :  { %289 = vmatmul.mubr.f32.gmra.mrb[20].mxu0 %v72_v50 }
  0x84   :  { %450 = vmatmul.mubr.f32.gmra.mrb[20].mxu1 %v72_v50  ;;  %294 = vmatprep.mubr.f32.mxu0 %v1728_v0 }
  0x85   :  { %455 = vmatprep.mubr.f32.mxu1 %v1728_v0 }
  0x87   :  { %295 = vmatmul.mubr.f32.gmra.mrb[22].mxu0 %v73_v51 }
  0x88   :  { %456 = vmatmul.mubr.f32.gmra.mrb[22].mxu1 %v73_v51  ;;  %300 = vmatprep.mubr.f32.mxu0 %v1728_v0 }
  0x89   :  { %461 = vmatprep.mubr.f32.mxu1 %v1728_v0 }
  0x8b   :  { %301 = vmatmul.mubr.f32.gmra.mrb[24].mxu0 %v74_v52 }
  0x8c   :  { %462 = vmatmul.mubr.f32.gmra.mrb[24].mxu1 %v74_v52  ;;  %306 = vmatprep.mubr.f32.mxu0 %v1728_v0 }
  0x8d   :  { %467 = vmatprep.mubr.f32.mxu1 %v1728_v0 }
  0x8f   :  { %307 = vmatmul.mubr.f32.gmra.mrb[26].mxu0 %v75_v53 }
  0x90   :  { %468 = vmatmul.mubr.f32.gmra.mrb[26].mxu1 %v75_v53  ;;  %312 = vmatprep.mubr.f32.mxu0 %v1728_v0 }
  0x91   :  { %473 = vmatprep.mubr.f32.mxu1 %v1728_v0 }
  0x93   :  { %313 = vmatmul.mubr.f32.gmra.mrb[28].mxu0 %v76_v54 }
  0x94   :  { %474 = vmatmul.mubr.f32.gmra.mrb[28].mxu1 %v76_v54  ;;  %318 = vmatprep.mubr.f32.mxu0 %v1728_v0 }
  0x95   :  { %479 = vmatprep.mubr.f32.mxu1 %v1728_v0  ;;  %v836_v0 = vld [vmem:[#allocation7 + $0xf0] sm:$0xff] }
  0x96   :  { %v1454_v10 = vpack.c.bf16 %v837_v8, %v836_v0 }
  0x97   :  { %319 = vmatmul.mubr.f32.gmra.mrb[30].mxu0 %v77_v55 }
  0x98   :  { %480 = vmatmul.mubr.f32.gmra.mrb[30].mxu1 %v77_v55  ;;  %1455 = vmatprep.subr.bf16.mxu0 %v1454_v10 }
  0x99   :  { %1457 = vmatpush3.bf16.msra.mxu0 %v1456_v14 }
 0x12e   :  { %v230_v28 = vpop.f32.mrb[0].mxu0 }
 0x12f   :  { %v231_v30 = vadd.f32 %v230_v28, %v1837_v25  ;;  %v391_v31 = vpop.f32.mrb[0].mxu1  ;;  %v232_v32 = vpop.f32.mrb[1].mxu0 }
 0x130   :  { %v393_v34 = vpop.f32.mrb[1].mxu1  ;;  %v392_v35 = vadd.f32 %v391_v31, %v1839_v27  ;;  %v233_v36 = vadd.f32 %v232_v32, %v1841_v29 }
 0x131   :  { %v550_v37 = vmul.f32 0.70710677, %v231_v30  ;;  %v394_v40 = vadd.f32 %v393_v34, %v1844_v33  ;;  %v486_v2 = vmul.f32 0.5, %v231_v30 }
 0x132   :  { %v236_v38 = vpop.f32.mrb[2].mxu0  ;;  %v552_v43 = vmul.f32 0.70710677, %v392_v35  ;;  %v551_v45 = vmul.f32 0.70710677, %v233_v36  ;;  %v1856_v3 = vmul.f32 0.5, %v392_v35 }
 0x133   :  { %v397_v39 = vpop.f32.mrb[2].mxu1  ;;  %v238_v41 = vpop.f32.mrb[3].mxu0  ;;  %v237_v44 = vadd.f32 %v236_v38, %v1837_v25  ;;  %1499 = verf.f32 %v550_v37  ;;  %v553_v49 = vmul.f32 0.70710677, %v394_v40  ;;  %v1859_v6 = vmul.f32 0.5, %v233_v36 }
 0x134   :  { %v399_v42 = vpop.f32.mrb[3].mxu1  ;;  %v239_v46 = vadd.f32 %v238_v41, %v1841_v29  ;;  %v398_v48 = vadd.f32 %v397_v39, %v1839_v27  ;;  %1501 = verf.f32 %v552_v43  ;;  %v1862_v10 = vmul.f32 0.5, %v394_v40 }
 0x135   :  { %v554_v52 = vmul.f32 0.70710677, %v237_v44  ;;  %v400_v53 = vadd.f32 %v399_v42, %v1844_v33  ;;  %1503 = verf.f32 %v551_v45  ;;  %v1864_v11 = vmul.f32 0.5, %v237_v44 }
 0x136   :  { %v242_v47 = vpop.f32.mrb[4].mxu0  ;;  %v555_v55 = vmul.f32 0.70710677, %v239_v46  ;;  %v556_v57 = vmul.f32 0.70710677, %v398_v48  ;;  %1505 = verf.f32 %v553_v49  ;;  %v1867_v16 = vmul.f32 0.5, %v398_v48 }
 0x137   :  { %v403_v50 = vpop.f32.mrb[4].mxu1  ;;  %v244_v51 = vpop.f32.mrb[5].mxu0  ;;  %v243_v58 = vadd.f32 %v242_v47, %v1837_v25  ;;  %1507 = verf.f32 %v554_v52  ;;  %v557_v63 = vmul.f32 0.70710677, %v400_v53  ;;  %v1870_v19 = vmul.f32 0.5, %v239_v46 }
 0x138   :  { %v405_v54 = vpop.f32.mrb[5].mxu1  ;;  %v404_v61 = vadd.f32 %v403_v50, %v1839_v27  ;;  %v245_v1 = vadd.f32 %v244_v51, %v1841_v29  ;;  %1509 = verf.f32 %v555_v55  ;;  %v1872_v20 = vmul.f32 0.5, %v400_v53 }
 0x139   :  { %v406_v4 = vadd.f32 %v405_v54, %v1844_v33  ;;  %1511 = verf.f32 %v556_v57  ;;  %v558_v7 = vmul.f32 0.70710677, %v243_v58  ;;  %v1875_v26 = vmul.f32 0.5, %v243_v58 }
 0x13a   :  { %v248_v56 = vpop.f32.mrb[6].mxu0  ;;  %v560_v12 = vmul.f32 0.70710677, %v404_v61  ;;  %1513 = verf.f32 %v557_v63  ;;  %v559_v17 = vmul.f32 0.70710677, %v245_v1  ;;  %v1877_v28 = vmul.f32 0.5, %v404_v61 }
 0x13b   :  { %v409_v59 = vpop.f32.mrb[6].mxu1  ;;  %v250_v60 = vpop.f32.mrb[7].mxu0  ;;  %v249_v0 = vadd.f32 %v248_v56, %v1837_v25  ;;  %v561_v21 = vmul.f32 0.70710677, %v406_v4  ;;  %1515 = verf.f32 %v558_v7  ;;  %v1879_v36 = vmul.f32 0.5, %v245_v1 }
 0x13c   :  { %v411_v62 = vpop.f32.mrb[7].mxu1  ;;  %v410_v13 = vadd.f32 %v409_v59, %v1839_v27  ;;  %v251_v18 = vadd.f32 %v250_v60, %v1841_v29  ;;  %1517 = verf.f32 %v560_v12  ;;  %v1881_v39 = vmul.f32 0.5, %v406_v4 }
 0x13d   :  { %v1500_v15 = vpop.eup %1499  ;;  %v412_v22 = vadd.f32 %v411_v62, %v1844_v33  ;;  %v562_v30 = vmul.f32 0.70710677, %v249_v0  ;;  %1519 = verf.f32 %v559_v17  ;;  %v1885_v49 = vmul.f32 0.5, %v249_v0 }
 0x13e   :  { %v254_v5 = vpop.f32.mrb[8].mxu0  ;;  %v1502_v24 = vpop.eup %1501  ;;  %v678_v35 = vadd.f32 1.0, %v1500_v15  ;;  %v564_v37 = vmul.f32 0.70710677, %v410_v13  ;;  %v563_v40 = vmul.f32 0.70710677, %v251_v18  ;;  %1521 = verf.f32 %v561_v21 }
 0x13f   :  { %v415_v8 = vpop.f32.mrb[8].mxu1  ;;  %v256_v9 = vpop.f32.mrb[9].mxu0  ;;  %v255_v41 = vadd.f32 %v254_v5, %v1837_v25  ;;  %v680_v43 = vadd.f32 1.0, %v1502_v24  ;;  %v565_v44 = vmul.f32 0.70710677, %v412_v22  ;;  %1523 = verf.f32 %v562_v30 }
 0x140   :  { %v417_v14 = vpop.f32.mrb[9].mxu1  ;;  %v1504_v34 = vpop.eup %1503  ;;  %v416_v45 = vadd.f32 %v415_v8, %v1839_v27  ;;  %v257_v50 = vadd.f32 %v256_v9, %v1841_v29  ;;  %v742_v54 = vmul.f32 %v678_v35, %v486_v2  ;;  %v1892_v55 = vmul.f32 0.5, %v410_v13 }
 0x141   :  { %v1506_v42 = vpop.eup %1505  ;;  %v679_v48 = vadd.f32 1.0, %v1504_v34  ;;  %1525 = verf.f32 %v564_v37  ;;  %v418_v56 = vadd.f32 %v417_v14, %v1844_v33  ;;  %v566_v60 = vmul.f32 0.70710677, %v255_v41 }
 0x142   :  { %v260_v23 = vpop.f32.mrb[10].mxu0  ;;  %v1508_v47 = vpop.eup %1507  ;;  %v681_v59 = vadd.f32 1.0, %v1506_v42  ;;  %1527 = verf.f32 %v563_v40  ;;  %v744_v62 = vmul.f32 %v680_v43, %v1856_v3  ;;  %v1899_v63 = vmul.f32 0.5, %v251_v18 }
 0x143   :  { %v421_v31 = vpop.f32.mrb[10].mxu1  ;;  %v262_v32 = vpop.f32.mrb[11].mxu0  ;;  %v261_v61 = vadd.f32 %v260_v23, %v1837_v25  ;;  %1529 = verf.f32 %v565_v44  ;;  %v568_v1 = vmul.f32 0.70710677, %v416_v45  ;;  %v1903_v7 = vmul.f32 0.5, %v412_v22 }
 0x144   :  { %v423_v38 = vpop.f32.mrb[11].mxu1  ;;  %v1510_v53 = vpop.eup %1509  ;;  %v567_v0 = vmul.f32 0.70710677, %v257_v50  ;;  %v743_v8 = vmul.f32 %v679_v48, %v1859_v6  ;;  %v682_v13 = vadd.f32 1.0, %v1508_v47  ;;  %v1910_v3 = vmul.f32 0.5, %v255_v41 }
 0x145   :  { %v1512_v58 = vpop.eup %1511  ;;  %v683_v5 = vadd.f32 1.0, %v1510_v53  ;;  %v569_v15 = vmul.f32 0.70710677, %v418_v56  ;;  %1531 = verf.f32 %v566_v60  ;;  %v570_v21 = vmul.f32 0.70710677, %v261_v61 }
 0x146   :  { %v266_v46 = vpop.f32.mrb[12].mxu0  ;;  %v1514_v4 = vpop.eup %1513  ;;  %v684_v14 = vadd.f32 1.0, %v1512_v58  ;;  %v422_v22 = vadd.f32 %v421_v31, %v1839_v27  ;;  %941 = vmatprep.mubr.f32.mxu0 %v743_v8  ;;  %v745_v23 = vmul.f32 %v681_v59, %v1862_v10  ;;  %v1916_v30 = vmul.f32 0.5, %v416_v45 }
 0x147   :  { %v1888_v51 = vpop.f32.mrb[12].mxu1  ;;  %v1890_v52 = vpop.f32.mrb[13].mxu0  ;;  %v685_v24 = vadd.f32 1.0, %v1514_v4  ;;  %1533 = verf.f32 %v568_v1  ;;  %v263_v34 = vadd.f32 %v262_v32, %v1841_v29  ;;  %942 = vmatmul.mubr.f32.vlgmr.msra.gmra.mrb[32].mxu0 %v742_v54  ;;  %v1921_v40 = vmul.f32 0.5, %v257_v50 }
 0x148   :  { %v1895_v57 = vpop.f32.mrb[13].mxu1  ;;  %v1516_v18 = vpop.eup %1515  ;;  %1535 = verf.f32 %v567_v0  ;;  %v424_v41 = vadd.f32 %v423_v38, %v1844_v33  ;;  %1086 = vmatprep.mubr.f32.mxu1 %v745_v23  ;;  %v747_v31 = vmul.f32 %v683_v5, %v1870_v19  ;;  %v1929_v45 = vmul.f32 0.5, %v418_v56 }
 0x149   :  { %v1518_v6 = vpop.eup %1517  ;;  %v686_v44 = vadd.f32 1.0, %v1516_v18  ;;  %1537 = verf.f32 %v569_v15  ;;  %1087 = vmatmul.mubr.f32.vlgmr.msra.gmra.mrb[32].mxu1 %v744_v62  ;;  %v267_v32 = vadd.f32 %v266_v46, %v1837_v25  ;;  %v1934_v38 = vmul.f32 0.5, %v261_v61 }
 0x14a   :  { %v1901_v2 = vpop.f32.mrb[14].mxu0  ;;  %v1520_v37 = vpop.eup %1519  ;;  %v688_v50 = vadd.f32 1.0, %v1518_v6  ;;  %1539 = verf.f32 %v570_v21  ;;  %v572_v19 = vmul.f32 0.70710677, %v422_v22  ;;  %946 = vmatprep.mubr.f32.mxu0 %v747_v31  ;;  %v571_v58 = vmul.f32 0.70710677, %v263_v34 }
 0x14b   :  { %v1906_v9 = vpop.f32.mrb[14].mxu1  ;;  %v1908_v12 = vpop.f32.mrb[15].mxu0  ;;  %v687_v54 = vadd.f32 1.0, %v1520_v37  ;;  %v428_v56 = vadd.f32 %v1888_v51, %v1839_v27  ;;  %v749_v59 = vmul.f32 %v685_v24, %v1872_v20  ;;  %v573_v1 = vmul.f32 0.70710677, %v424_v41 }
 0x14c   :  { %v1912_v17 = vpop.f32.mrb[15].mxu1  ;;  %v1522_v43 = vpop.eup %1521  ;;  %v746_v4 = vmul.f32 %v682_v13, %v1864_v11  ;;  %v748_v61 = vmul.f32 %v684_v14, %v1867_v16  ;;  %v1949_v18 = vmul.f32 0.5, %v422_v22  ;;  %v574_v51 = vmul.f32 0.70710677, %v267_v32 }
 0x14d   :  { %v1524_v48 = vpop.eup %1523  ;;  %v689_v62 = vadd.f32 1.0, %v1522_v43  ;;  %v269_v20 = vadd.f32 %v1890_v52, %v1841_v29  ;;  %1091 = vmatprep.mubr.f32.mxu1 %v749_v59  ;;  %1541 = verf.f32 %v572_v19  ;;  %v1955_v11 = vmul.f32 0.5, %v263_v34 }
 0x14e   :  { %v1919_v35 = vpop.f32.mrb[16].mxu0  ;;  %v1526_v53 = vpop.eup %1525  ;;  %v1947_v15 = vadd.f32 1.0, %v1524_v48  ;;  %v1957_v16 = vmul.f32 0.5, %v424_v41  ;;  %v430_v13 = vadd.f32 %v1895_v57, %v1844_v33  ;;  %947 = vmatmul.mubr.f32.gmra.mrb[34].mxu0 %v746_v4  ;;  %1092 = vmatmul.mubr.f32.gmra.mrb[34].mxu1 %v748_v61  ;;  %1543 = verf.f32 %v571_v58 }
 0x14f   :  { %v1925_v10 = vpop.f32.mrb[16].mxu1  ;;  %v1927_v42 = vpop.f32.mrb[17].mxu0  ;;  %v1961_v14 = vadd.f32 1.0, %v1526_v53  ;;  %v576_v23 = vmul.f32 0.70710677, %v428_v56  ;;  %1545 = verf.f32 %v573_v1  ;;  %v1965_v37 = vmul.f32 0.5, %v267_v32 }
 0x150   :  { %v1932_v47 = vpop.f32.mrb[17].mxu1  ;;  %v1528_v46 = vpop.eup %1527  ;;  %v273_v34 = vadd.f32 %v1901_v2, %v1837_v25  ;;  %1547 = verf.f32 %v574_v51  ;;  %v1969_v57 = vmul.f32 0.5, %v428_v56  ;;  %v575_v31 = vmul.f32 0.70710677, %v269_v20 }
 0x151   :  { %v1530_v8 = vpop.eup %1529  ;;  %v691_v22 = vadd.f32 1.0, %v1528_v46  ;;  %v751_v43 = vmul.f32 %v687_v54, %v1879_v36  ;;  %v577_v58 = vmul.f32 0.70710677, %v430_v13  ;;  %v434_v32 = vadd.f32 %v1906_v9, %v1839_v27 }
 0x152   :  { %v1939_v60 = vpop.f32.mrb[18].mxu0  ;;  %v1532_v52 = vpop.eup %1531  ;;  %v693_v24 = vadd.f32 1.0, %v1530_v8  ;;  %v753_v59 = vmul.f32 %v689_v62, %v1881_v39  ;;  %v750_v2 = vmul.f32 %v686_v44, %v1875_v26  ;;  %1549 = verf.f32 %v576_v23 }
 0x153   :  { %v1943_v5 = vpop.f32.mrb[18].mxu1  ;;  %v1945_v0 = vpop.f32.mrb[19].mxu0  ;;  %v1982_v1 = vmul.f32 0.5, %v269_v20  ;;  %v275_v36 = vadd.f32 %v1908_v12, %v1841_v29  ;;  %951 = vmatprep.mubr.f32.mxu0 %v751_v43  ;;  %v752_v54 = vmul.f32 %v688_v50, %v1877_v28  ;;  %v1989_v9 = vadd.f32 1.0, %v1532_v52 }
 0x154   :  { %v1953_v21 = vpop.f32.mrb[19].mxu1  ;;  %v1534_v41 = vpop.eup %1533  ;;  %v1991_v39 = vmul.f32 0.5, %v430_v13  ;;  %v578_v26 = vmul.f32 0.70710677, %v273_v34  ;;  %v436_v44 = vadd.f32 %v1912_v17, %v1844_v33  ;;  %1096 = vmatprep.mubr.f32.mxu1 %v753_v59  ;;  %952 = vmatmul.mubr.f32.gmra.mrb[36].mxu0 %v750_v2  ;;  %1551 = verf.f32 %v575_v31 }
 0x155   :  { %v1536_v53 = vpop.eup %1535  ;;  %v1999_v12 = vadd.f32 1.0, %v1534_v41  ;;  %1097 = vmatmul.mubr.f32.gmra.mrb[36].mxu1 %v752_v54  ;;  %v755_v28 = vmul.f32 %v691_v22, %v1899_v63  ;;  %v757_v50 = vmul.f32 %v693_v24, %v1903_v7  ;;  %1553 = verf.f32 %v577_v58 }
 0x156   :  { %v1963_v6 = vpop.f32.mrb[20].mxu0  ;;  %v1538_v56 = vpop.eup %1537  ;;  %v695_v20 = vadd.f32 1.0, %v1536_v53  ;;  %v580_v13 = vmul.f32 0.70710677, %v434_v32  ;;  %v279_v17 = vadd.f32 %v1919_v35, %v1837_v25  ;;  %v2009_v43 = vmul.f32 0.5, %v273_v34 }
 0x157   :  { %v1972_v48 = vpop.f32.mrb[20].mxu1  ;;  %v1974_v19 = vpop.f32.mrb[21].mxu0  ;;  %v697_v23 = vadd.f32 1.0, %v1538_v56  ;;  %v579_v41 = vmul.f32 0.70710677, %v275_v36  ;;  %956 = vmatprep.mubr.f32.mxu0 %v755_v28  ;;  %1101 = vmatprep.mubr.f32.mxu1 %v757_v50  ;;  %1555 = verf.f32 %v578_v26  ;;  %v440_v22 = vadd.f32 %v1925_v10, %v1839_v27 }
 0x158   :  { %v1980_v46 = vpop.f32.mrb[21].mxu1  ;;  %v1540_v61 = vpop.eup %1539  ;;  %v581_v7 = vmul.f32 0.70710677, %v436_v44  ;;  %v754_v24 = vmul.f32 %v1947_v15, %v1885_v49  ;;  %v2021_v58 = vmul.f32 0.5, %v434_v32  ;;  %v2023_v59 = vmul.f32 0.5, %v275_v36 }
 0x159   :  { %v2007_v52 = vadd.f32 1.0, %v1540_v61  ;;  %v1542_v63 = vpop.eup %1541  ;;  %v281_v2 = vadd.f32 %v1927_v42, %v1841_v29  ;;  %v756_v56 = vmul.f32 %v1961_v14, %v1892_v55  ;;  %1557 = verf.f32 %v580_v13 }
 0x15a   :  { %v1987_v4 = vpop.f32.mrb[22].mxu0  ;;  %v1544_v34 = vpop.eup %1543  ;;  %v2031_v49 = vmul.f32 0.5, %v436_v44  ;;  %v582_v15 = vmul.f32 0.70710677, %v279_v17  ;;  %v442_v61 = vadd.f32 %v1932_v47, %v1844_v33  ;;  %957 = vmatmul.mubr.f32.gmra.mrb[38].mxu0 %v754_v24  ;;  %v2035_v36 = vadd.f32 1.0, %v1542_v63 }
 0x15b   :  { %v1995_v62 = vpop.f32.mrb[22].mxu1  ;;  %v1997_v8 = vpop.f32.mrb[23].mxu0  ;;  %1559 = verf.f32 %v579_v41  ;;  %1102 = vmatmul.mubr.f32.gmra.mrb[38].mxu1 %v756_v56  ;;  %v759_v42 = vmul.f32 %v695_v20, %v1921_v40  ;;  %v761_v55 = vmul.f32 %v697_v23, %v1929_v45  ;;  %v699_v26 = vadd.f32 1.0, %v1544_v34 }
 0x15c   :  { %v2003_v51 = vpop.f32.mrb[23].mxu1  ;;  %v1546_v10 = vpop.eup %1545  ;;  %1561 = verf.f32 %v581_v7  ;;  %v584_v44 = vmul.f32 0.70710677, %v440_v22  ;;  %v285_v28 = vadd.f32 %v1939_v60, %v1837_v25  ;;  %v2045_v63 = vmul.f32 0.5, %v279_v17 }
 0x15d   :  { %v1548_v32 = vpop.eup %1547  ;;  %v701_v13 = vadd.f32 1.0, %v1546_v10  ;;  %v583_v41 = vmul.f32 0.70710677, %v281_v2  ;;  %v446_v40 = vadd.f32 %v1943_v5, %v1839_v27  ;;  %961 = vmatprep.mubr.f32.mxu0 %v759_v42  ;;  %1106 = vmatprep.mubr.f32.mxu1 %v761_v55  ;;  %1563 = verf.f32 %v582_v15 }
 0x15e   :  { %v2011_v31 = vpop.f32.mrb[24].mxu0  ;;  %v1550_v47 = vpop.eup %1549  ;;  %v585_v23 = vmul.f32 0.70710677, %v442_v61  ;;  %v287_v60 = vadd.f32 %v1945_v0, %v1841_v29  ;;  %v758_v7 = vmul.f32 %v1989_v9, %v1910_v3  ;;  %v2057_v24 = vadd.f32 1.0, %v1548_v32 }
 0x15f   :  { %v2017_v35 = vpop.f32.mrb[24].mxu1  ;;  %v2019_v53 = vpop.f32.mrb[25].mxu0  ;;  %v2059_v34 = vmul.f32 0.5, %v440_v22  ;;  %v2061_v5 = vmul.f32 0.5, %v281_v2  ;;  %v760_v56 = vmul.f32 %v1999_v12, %v1916_v30  ;;  %v2067_v42 = vadd.f32 1.0, %v1550_v47 }
 0x160   :  { %v2029_v54 = vpop.f32.mrb[25].mxu1  ;;  %v1552_v17 = vpop.eup %1551  ;;  %1565 = verf.f32 %v584_v44  ;;  %v586_v0 = vmul.f32 0.70710677, %v285_v28  ;;  %v448_v3 = vadd.f32 %v1953_v21, %v1844_v33  ;;  %962 = vmatmul.mubr.f32.gmra.mrb[40].mxu0 %v758_v7  ;;  %v588_v2 = vmul.f32 0.70710677, %v446_v40 }
 0x161   :  { %v1554_v15 = vpop.eup %1553  ;;  %1567 = verf.f32 %v583_v41  ;;  %1107 = vmatmul.mubr.f32.gmra.mrb[40].mxu1 %v760_v56  ;;  %v763_v30 = vmul.f32 %v699_v26, %v1955_v11  ;;  %v765_v12 = vmul.f32 %v701_v13, %v1957_v16  ;;  %v2079_v44 = vmul.f32 0.5, %v442_v61 }
 0x162   :  { %v2039_v14 = vpop.f32.mrb[26].mxu0  ;;  %v1556_v55 = vpop.eup %1555  ;;  %1569 = verf.f32 %v585_v23  ;;  %v587_v47 = vmul.f32 0.70710677, %v287_v60  ;;  %v291_v21 = vadd.f32 %v1963_v6, %v1837_v25  ;;  %v703_v7 = vadd.f32 1.0, %v1552_v17 }
 0x163   :  { %v2043_v50 = vpop.f32.mrb[26].mxu1  ;;  %v2049_v45 = vpop.f32.mrb[27].mxu0  ;;  %v452_v41 = vadd.f32 %v1972_v48, %v1839_v27  ;;  %966 = vmatprep.mubr.f32.mxu0 %v763_v30  ;;  %1111 = vmatprep.mubr.f32.mxu1 %v765_v12  ;;  %1571 = verf.f32 %v586_v0  ;;  %v589_v61 = vmul.f32 0.70710677, %v448_v3  ;;  %v293_v26 = vadd.f32 %v1974_v19, %v1841_v29 }
 0x164   :  { %v2051_v20 = vpop.f32.mrb[27].mxu1  ;;  %v1558_v16 = vpop.eup %1557  ;;  %v762_v6 = vmul.f32 %v2007_v52, %v1934_v38  ;;  %v2097_v17 = vadd.f32 1.0, %v1556_v55  ;;  %v2099_v48 = vmul.f32 0.5, %v446_v40  ;;  %1573 = verf.f32 %v588_v2 }
 0x165   :  { %v1560_v23 = vpop.eup %1559  ;;  %v764_v56 = vmul.f32 %v2035_v36, %v1949_v18  ;;  %v2105_v19 = vmul.f32 0.5, %v287_v60  ;;  %1575 = verf.f32 %v587_v47  ;;  %v590_v38 = vmul.f32 0.70710677, %v291_v21 }
 0x166   :  { %v2065_v10 = vpop.f32.mrb[28].mxu0  ;;  %v1562_v0 = vpop.eup %1561  ;;  %v454_v52 = vadd.f32 %v1980_v46, %v1844_v33  ;;  %967 = vmatmul.mubr.f32.gmra.mrb[42].mxu0 %v762_v6  ;;  %v592_v30 = vmul.f32 0.70710677, %v452_v41  ;;  %v2111_v40 = vadd.f32 %v1987_v4, %v1837_v25  ;;  %v767_v2 = vmul.f32 %v703_v7, %v1982_v1 }
 0x167   :  { %v2071_v9 = vpop.f32.mrb[28].mxu1  ;;  %v2073_v22 = vpop.f32.mrb[29].mxu0  ;;  %1112 = vmatmul.mubr.f32.gmra.mrb[42].mxu1 %v764_v56  ;;  %v708_v12 = vadd.f32 1.0, %v1558_v16  ;;  %1577 = verf.f32 %v589_v61  ;;  %v591_v60 = vmul.f32 0.70710677, %v293_v26  ;;  %v2117_v55 = vadd.f32 %v1997_v8, %v1841_v29 }
 0x168   :  { %2310 = vst [vmem:[#allocation12_spill] sm:$0xff] %v2071_v9  ;;  %2311 = vst [vmem:[#allocation13_spill] sm:$0xff] %v2073_v22  ;;  %v2077_v32 = vpop.f32.mrb[29].mxu1  ;;  %v705_v9 = vadd.f32 1.0, %v1554_v15  ;;  %v2083_v22 = vmul.f32 0.5, %v285_v28  ;;  %v1564_v36 = vpop.eup %1563  ;;  %v707_v46 = vadd.f32 1.0, %v1560_v23  ;;  %v2123_v4 = vadd.f32 %v2003_v51, %v1844_v33  ;;  %971 = vmatprep.mubr.f32.mxu0 %v767_v2 }
 0x169   :  { %v709_v47 = vadd.f32 1.0, %v1562_v0  ;;  %v2119_v6 = vmul.f32 0.5, %v448_v3  ;;  %1579 = verf.f32 %v590_v38  ;;  %v766_v7 = vmul.f32 %v2057_v24, %v1965_v37 }
 0x16a   :  { %v2087_v11 = vpop.f32.mrb[30].mxu0  ;;  %v769_v18 = vmul.f32 %v705_v9, %v1991_v39  ;;  %v1566_v1 = vpop.eup %1565  ;;  %v2125_v39 = vmul.f32 0.5, %v291_v21  ;;  %v593_v9 = vmul.f32 0.70710677, %v454_v52  ;;  %v2129_v16 = vadd.f32 1.0, %v1564_v36 }
 0x16b   :  { %v2093_v13 = vpop.f32.mrb[30].mxu1  ;;  %v2095_v28 = vpop.f32.mrb[31].mxu0  ;;  %1581 = verf.f32 %v592_v30  ;;  %v594_v3 = vmul.f32 0.70710677, %v2111_v40  ;;  %v768_v51 = vmul.f32 %v2067_v42, %v1969_v57  ;;  %v2136_v21 = vadd.f32 %v1995_v62, %v1839_v27  ;;  %972 = vmatmul.mubr.f32.gmra.mrb[44].mxu0 %v766_v7 }
 0x16c   :  { %v2103_v15 = vpop.f32.mrb[31].mxu1  ;;  %1116 = vmatprep.mubr.f32.mxu1 %v769_v18  ;;  %v1568_v8 = vpop.eup %1567  ;;  %1583 = verf.f32 %v591_v60  ;;  %v595_v23 = vmul.f32 0.70710677, %v2117_v55  ;;  %v2141_v37 = vadd.f32 %v2019_v53, %v1841_v29  ;;  %v597_v24 = vmul.f32 0.70710677, %v2123_v4 }
 0x16d   :  { %v1570_v61 = vpop.eup %1569  ;;  %1117 = vmatmul.mubr.f32.gmra.mrb[44].mxu1 %v768_v51  ;;  %v2146_v56 = vadd.f32 %v2029_v54, %v1844_v33  ;;  %v771_v57 = vmul.f32 %v707_v46, %v2023_v59  ;;  %v773_v42 = vmul.f32 %v709_v47, %v2031_v49  ;;  %v2150_v0 = vmul.f32 0.5, %v452_v41 }
 0x16e   :  { %v1572_v62 = vpop.eup %1571  ;;  %v2152_v38 = vmul.f32 0.5, %v293_v26  ;;  %1585 = verf.f32 %v593_v9  ;;  %v2156_v53 = vadd.f32 %v2011_v31, %v1837_v25  ;;  %v712_v2 = vadd.f32 1.0, %v1566_v1 }
 0x16f   :  { %v1574_v30 = vpop.eup %1573  ;;  %v711_v18 = vadd.f32 1.0, %v1568_v8  ;;  %v713_v36 = vadd.f32 1.0, %v1570_v61  ;;  %1587 = verf.f32 %v594_v3  ;;  %976 = vmatprep.mubr.f32.mxu0 %v771_v57  ;;  %1121 = vmatprep.mubr.f32.mxu1 %v773_v42  ;;  %v2158_v54 = vmul.f32 0.5, %v454_v52 }
 0x170   :  { %v1576_v59 = vpop.eup %1575  ;;  %1589 = verf.f32 %v595_v23  ;;  %v599_v49 = vmul.f32 0.70710677, %v2141_v37  ;;  %v770_v41 = vmul.f32 %v2097_v17, %v2009_v43  ;;  %v596_v26 = vmul.f32 0.70710677, %v2136_v21 }
 0x171   :  { %1591 = verf.f32 %v597_v24  ;;  %v601_v31 = vmul.f32 0.70710677, %v2146_v56  ;;  %v772_v60 = vmul.f32 %v708_v12, %v2021_v58  ;;  %v1578_v46 = vpop.eup %1577  ;;  %v598_v47 = vmul.f32 0.70710677, %v2156_v53 }
 0x172   :  { %v2169_v52 = vadd.f32 %v2017_v35, %v1839_v27  ;;  %977 = vmatmul.mubr.f32.gmra.mrb[46].mxu0 %v770_v41  ;;  %v2173_v1 = vadd.f32 %v2049_v45, %v1841_v29  ;;  %v2177_v43 = vadd.f32 %v2051_v20, %v1844_v33  ;;  %v2181_v58 = vadd.f32 %v2039_v14, %v1837_v25 }
 0x173   :  { %1122 = vmatmul.mubr.f32.gmra.mrb[46].mxu1 %v772_v60  ;;  %v2185_v17 = vadd.f32 %v2043_v50, %v1839_v27  ;;  %v775_v35 = vmul.f32 %v711_v18, %v2061_v5  ;;  %v777_v12 = vmul.f32 %v713_v36, %v2079_v44  ;;  %v1580_v9 = vpop.eup %1579  ;;  %v714_v45 = vadd.f32 1.0, %v1572_v62  ;;  %v2312_v62 = vld [vmem:[#allocation13_spill] sm:$0xff] }
 0x174   :  { %v716_v7 = vadd.f32 1.0, %v1574_v30  ;;  %v2190_v8 = vmul.f32 0.5, %v2111_v40  ;;  %1593 = verf.f32 %v599_v49  ;;  %v715_v3 = vadd.f32 1.0, %v1576_v59 }
 0x175   :  { %v1582_v20 = vpop.eup %1581  ;;  %v717_v51 = vadd.f32 1.0, %v1578_v46  ;;  %1595 = verf.f32 %v601_v31  ;;  %v603_v14 = vmul.f32 0.70710677, %v2173_v1  ;;  %981 = vmatprep.mubr.f32.mxu0 %v775_v35  ;;  %1126 = vmatprep.mubr.f32.mxu1 %v777_v12  ;;  %v600_v5 = vmul.f32 0.70710677, %v2169_v52 }
 0x176   :  { %v1584_v50 = vpop.eup %1583  ;;  %1597 = verf.f32 %v596_v26  ;;  %v605_v44 = vmul.f32 0.70710677, %v2177_v43  ;;  %v774_v61 = vmul.f32 %v2129_v16, %v2045_v63  ;;  %v602_v40 = vmul.f32 0.70710677, %v2181_v58 }
 0x177   :  { %1599 = verf.f32 %v598_v47  ;;  %v604_v23 = vmul.f32 0.70710677, %v2185_v17  ;;  %v776_v24 = vmul.f32 %v712_v2, %v2059_v34  ;;  %v2202_v42 = vadd.f32 %v2065_v10, %v1837_v25  ;;  %v2313_v34 = vld [vmem:[#allocation12_spill] sm:$0xff] }
 0x178   :  { %v1586_v57 = vpop.eup %1585  ;;  %1601 = verf.f32 %v603_v14  ;;  %982 = vmatmul.mubr.f32.gmra.mrb[48].mxu0 %v774_v61  ;;  %v2206_v30 = vadd.f32 %v2312_v62, %v1841_v29  ;;  %v2210_v63 = vadd.f32 %v2077_v32, %v1844_v33  ;;  %v2214_v2 = vadd.f32 %v2313_v34, %v1839_v27 }
 0x179   :  { %v1588_v16 = vpop.eup %1587  ;;  %1603 = verf.f32 %v605_v44  ;;  %1127 = vmatmul.mubr.f32.gmra.mrb[48].mxu1 %v776_v24  ;;  %v779_v18 = vmul.f32 %v715_v3, %v2105_v19  ;;  %v781_v10 = vmul.f32 %v717_v51, %v2119_v6  ;;  %v718_v59 = vadd.f32 1.0, %v1580_v9 }
 0x17a   :  { %v1590_v36 = vpop.eup %1589  ;;  %v531_v49 = vmul.f32 0.5, %v2117_v55  ;;  %v533_v41 = vmul.f32 0.5, %v2123_v4  ;;  %1605 = verf.f32 %v600_v5  ;;  %v719_v26 = vadd.f32 1.0, %v1584_v50 }
 0x17b   :  { %v1592_v32 = vpop.eup %1591  ;;  %v721_v31 = vadd.f32 1.0, %v1586_v57  ;;  %1607 = verf.f32 %v602_v40  ;;  %v607_v60 = vmul.f32 0.70710677, %v2206_v30  ;;  %986 = vmatprep.mubr.f32.mxu0 %v779_v18  ;;  %1131 = vmatprep.mubr.f32.mxu1 %v781_v10  ;;  %v606_v19 = vmul.f32 0.70710677, %v2202_v42 }
 0x17c   :  { %1609 = verf.f32 %v604_v23  ;;  %v609_v6 = vmul.f32 0.70710677, %v2210_v63  ;;  %v778_v46 = vmul.f32 %v714_v45, %v2083_v22  ;;  %v608_v55 = vmul.f32 0.70710677, %v2214_v2 }
 0x17d   :  { %1611 = verf.f32 %v607_v60  ;;  %v780_v4 = vmul.f32 %v716_v7, %v2099_v48  ;;  %v2228_v47 = vadd.f32 %v2087_v11, %v1837_v25  ;;  %v2232_v12 = vadd.f32 %v2093_v13, %v1839_v27 }
 0x17e   :  { %v1594_v35 = vpop.eup %1593  ;;  %1613 = verf.f32 %v609_v6  ;;  %987 = vmatmul.mubr.f32.gmra.mrb[50].mxu0 %v778_v46  ;;  %v2236_v9 = vadd.f32 %v2095_v28, %v1841_v29  ;;  %v2240_v22 = vadd.f32 %v2103_v15, %v1844_v33  ;;  %v720_v45 = vadd.f32 1.0, %v1582_v20 }
 0x17f   :  { %v1596_v48 = vpop.eup %1595  ;;  %v723_v7 = vadd.f32 1.0, %v1590_v36  ;;  %1132 = vmatmul.mubr.f32.gmra.mrb[50].mxu1 %v780_v4  ;;  %v783_v25 = vmul.f32 %v719_v26, %v2152_v38  ;;  %v785_v11 = vmul.f32 %v721_v31, %v2158_v54  ;;  %v722_v51 = vadd.f32 1.0, %v1588_v16 }
 0x180   :  { %v1598_v3 = vpop.eup %1597  ;;  %v725_v27 = vadd.f32 1.0, %v1592_v32  ;;  %v535_v13 = vmul.f32 0.5, %v2141_v37  ;;  %1615 = verf.f32 %v606_v19  ;;  %v727_v28 = vadd.f32 1.0, %v1594_v35 }
 0x181   :  { %v1600_v29 = vpop.eup %1599  ;;  %1617 = verf.f32 %v608_v55  ;;  %v610_v33 = vmul.f32 0.70710677, %v2228_v47  ;;  %v611_v15 = vmul.f32 0.70710677, %v2236_v9  ;;  %991 = vmatprep.mubr.f32.mxu0 %v783_v25  ;;  %1136 = vmatprep.mubr.f32.mxu1 %v785_v11  ;;  %v729_v14 = vadd.f32 1.0, %v1596_v48 }
 0x182   :  { %v1602_v20 = vpop.eup %1601  ;;  %v612_v38 = vmul.f32 0.70710677, %v2232_v12  ;;  %v613_v54 = vmul.f32 0.70710677, %v2240_v22  ;;  %v782_v50 = vmul.f32 %v718_v59, %v2125_v39  ;;  %v724_v37 = vadd.f32 1.0, %v1598_v3 }
 0x183   :  { %v1604_v5 = vpop.eup %1603  ;;  %1619 = verf.f32 %v611_v15  ;;  %v784_v44 = vmul.f32 %v720_v45, %v2150_v0  ;;  %v787_v61 = vmul.f32 %v723_v7, %v531_v49  ;;  %v532_v23 = vmul.f32 0.5, %v2136_v21 }
 0x184   :  { %v1606_v40 = vpop.eup %1605  ;;  %v537_v24 = vmul.f32 0.5, %v2146_v56  ;;  %1621 = verf.f32 %v613_v54  ;;  %992 = vmatmul.mubr.f32.gmra.mrb[52].mxu0 %v782_v50  ;;  %v789_v57 = vmul.f32 %v725_v27, %v533_v41  ;;  %v726_v16 = vadd.f32 1.0, %v1600_v29 }
 0x185   :  { %v1608_v62 = vpop.eup %1607  ;;  %v731_v34 = vadd.f32 1.0, %v1602_v20  ;;  %1623 = verf.f32 %v610_v33  ;;  %1137 = vmatmul.mubr.f32.gmra.mrb[52].mxu1 %v784_v44  ;;  %996 = vmatprep.mubr.f32.mxu0 %v787_v61  ;;  %v791_v39 = vmul.f32 %v727_v28, %v535_v13  ;;  %v733_v10 = vadd.f32 1.0, %v1604_v5  ;;  %v2271_v61 = vld [vmem:[%s2308_s4] ss:$0 sm:$0xff]  ;;  %s1729_s4 = smov [#allocation8]  }
 0x186   :  { %v1610_v18 = vpop.eup %1609  ;;  %1625 = verf.f32 %v612_v38  ;;  %1141 = vmatprep.mubr.f32.mxu1 %v789_v57  ;;  %v786_v0 = vmul.f32 %v722_v51, %v2190_v8  ;;  %v793_v36 = vmul.f32 %v729_v14, %v537_v24  ;;  %v728_v59 = vadd.f32 1.0, %v1606_v40  ;;  %s1188_s8 = sshll.u32 %s1729_s4, 4  ;;  %s1189_s8 = int_to_ptr.vmem [resolvable:$true] %s1188_s8 }
 0x187   :  { %v1612_v21 = vpop.eup %1611  ;;  %v539_v56 = vmul.f32 0.5, %v2173_v1  ;;  %v788_v49 = vmul.f32 %v724_v37, %v532_v23  ;;  %v534_v32 = vmul.f32 0.5, %v2156_v53  ;;  %v541_v26 = vmul.f32 0.5, %v2177_v43  ;;  %s1693_s9 = scalar_lea.vmem %s1189_s8, 2048  ;;  %p1698_p11 = scmp.lt.s32.totalorder %s1189_s8, %s1189_s8 }
 0x188   :  { %v1614_v41 = vpop.eup %1613  ;;  %997 = vmatmul.mubr.f32.gmra.mrb[54].mxu0 %v786_v0  ;;  %v536_v31 = vmul.f32 0.5, %v2169_v52  ;;  %v735_v60 = vadd.f32 1.0, %v1612_v21  ;;  %v730_v8 = vadd.f32 1.0, %v1608_v62  ;;  %v732_v35 = vadd.f32 1.0, %v1610_v18  ;;  %p1694_p10 = scmp.ne.s32.totalorder %s1189_s8, %s1693_s9  ;;  %p1699_p12 = scmp.lt.s32.totalorder %s1693_s9, %s1693_s9 }
 0x189   :  { %1142 = vmatmul.mubr.f32.gmra.mrb[54].mxu1 %v788_v49  ;;  %1001 = vmatprep.mubr.f32.mxu0 %v791_v39  ;;  %v795_v19 = vmul.f32 %v731_v34, %v539_v56  ;;  %v737_v46 = vadd.f32 1.0, %v1614_v41  ;;  %v790_v55 = vmul.f32 %v726_v16, %v534_v32  ;;  %v797_v4 = vmul.f32 %v733_v10, %v541_v26 }
 0x18a   :  { %v1616_v6 = vpop.eup %1615  ;;  %1146 = vmatprep.mubr.f32.mxu1 %v793_v36  ;;  %v543_v48 = vmul.f32 0.5, %v2206_v30  ;;  %v792_v53 = vmul.f32 %v728_v59, %v536_v31  ;;  %v538_v43 = vmul.f32 0.5, %v2181_v58  ;;  %v545_v45 = vmul.f32 0.5, %v2210_v63  ;;  %p1700_p13 = por %p1699_p12, %p1698_p11 }
 0x18b   :  { %v1618_v1 = vpop.eup %1617  ;;  %v540_v7 = vmul.f32 0.5, %v2185_v17  ;;  %v734_v3 = vadd.f32 1.0, %v1616_v6  ;;  %v547_v28 = vmul.f32 0.5, %v2236_v9  ;;  %v542_v15 = vmul.f32 0.5, %v2202_v42 }
 0x18c   :  { %1002 = vmatmul.mubr.f32.gmra.mrb[56].mxu0 %v790_v55  ;;  %v799_v25 = vmul.f32 %v735_v60, %v543_v48  ;;  %v794_v27 = vmul.f32 %v730_v8, %v538_v43  ;;  %v801_v13 = vmul.f32 %v737_v46, %v545_v45  ;;  %v736_v30 = vadd.f32 1.0, %v1618_v1  ;;  %p1701_p0 = pnand %p1700_p13, %p1694_p10 }
 0x18d   :  { %v1620_v52 = vpop.eup %1619  ;;  %1147 = vmatmul.mubr.f32.gmra.mrb[56].mxu1 %v792_v53  ;;  %1006 = vmatprep.mubr.f32.mxu0 %v795_v19  ;;  %v796_v33 = vmul.f32 %v732_v35, %v540_v7  ;;  %v549_v17 = vmul.f32 0.5, %v2240_v22  ;;  %v544_v20 = vmul.f32 0.5, %v2214_v2  ;;  %v798_v54 = vmul.f32 %v734_v3, %v542_v15 }
 0x18e   :  { %v1622_v11 = vpop.eup %1621  ;;  %v739_v51 = vadd.f32 1.0, %v1620_v52  ;;  %1151 = vmatprep.mubr.f32.mxu1 %v797_v4  ;;  %v546_v9 = vmul.f32 0.5, %v2228_v47  ;;  %v548_v44 = vmul.f32 0.5, %v2232_v12 }
 0x18f   :  { %v1624_v29 = vpop.eup %1623  ;;  %v741_v58 = vadd.f32 1.0, %v1622_v11  ;;  %v800_v37 = vmul.f32 %v736_v30, %v544_v20 }
 0x190   :  { %v1626_v63 = vpop.eup %1625  ;;  %1007 = vmatmul.mubr.f32.gmra.mrb[58].mxu0 %v794_v27  ;;  %v803_v14 = vmul.f32 %v739_v51, %v547_v28  ;;  %v738_v38 = vadd.f32 1.0, %v1624_v29 }
 0x191   :  { %1152 = vmatmul.mubr.f32.gmra.mrb[58].mxu1 %v796_v33  ;;  %1011 = vmatprep.mubr.f32.mxu0 %v799_v25  ;;  %v805_v50 = vmul.f32 %v741_v58, %v549_v17  ;;  %v740_v5 = vadd.f32 1.0, %v1626_v63 }
 0x192   :  { %1156 = vmatprep.mubr.f32.mxu1 %v801_v13  ;;  %v802_v42 = vmul.f32 %v738_v38, %v546_v9 }
 0x193   :  { %v804_v22 = vmul.f32 %v740_v5, %v548_v44 }
 0x194   :  { %1012 = vmatmul.mubr.f32.gmra.mrb[60].mxu0 %v798_v54 }
 0x195   :  { %1157 = vmatmul.mubr.f32.gmra.mrb[60].mxu1 %v800_v37  ;;  %1016 = vmatprep.mubr.f32.mxu0 %v803_v14 }
 0x196   :  { %1161 = vmatprep.mubr.f32.mxu1 %v805_v50 }
 0x198   :  { %1017 = vmatmul.mubr.f32.gmra.mrb[62].mxu0 %v802_v42 }
 0x199   :  { %1162 = vmatmul.mubr.f32.gmra.mrb[62].mxu1 %v804_v22 }
 0x21a   :  { %v1234_v2 = vpop.f32.mrb[32].mxu0 }
 0x21b   :  { %v1235_v40 = vpop.f32.mrb[33].mxu0 }
 0x21c   :  { %v1314_v23 = vpop.f32.mrb[32].mxu1  ;;  %v1236_v24 = vadd.f32 %v1235_v40, %v1234_v2 }
 0x21d   :  { %v1315_v47 = vpop.f32.mrb[33].mxu1 }
 0x21e   :  { %v944_v57 = vadd.f32 %v1236_v24, %v2271_v61  ;;  %v1316_v12 = vadd.f32 %v1315_v47, %v1314_v23 }
 0x220   :  { %v1089_v62 = vadd.f32 %v1316_v12, %v944_v57 }
 0x221   :  { %v1237_v16 = vpop.f32.mrb[34].mxu0  ;;  %v1317_v34 = vpop.f32.mrb[34].mxu1 }
 0x222   :  { %1167 = vst [vmem:[#allocation8] sm:$0xff] %v1089_v62  ;;  %v1238_v39 = vpop.f32.mrb[35].mxu0  ;;  %v1318_v18 = vpop.f32.mrb[35].mxu1 }
 0x223   :  { %v1239_v10 = vadd.f32 %v1238_v39, %v1237_v16  ;;  %v1319_v0 = vadd.f32 %v1318_v18, %v1317_v34 }
 0x225   :  { %v949_v36 = vadd.f32 %v1239_v10, %v2271_v61 }
 0x227   :  { %v1094_v21 = vadd.f32 %v1319_v0, %v949_v36  ;;  %v1240_v59 = vpop.f32.mrb[36].mxu0 }
 0x228   :  { %v1320_v56 = vpop.f32.mrb[36].mxu1  ;;  %v1241_v49 = vpop.f32.mrb[37].mxu0 }
 0x229   :  { %1168 = vst [vmem:[#allocation8 + $0x8] sm:$0xff] %v1094_v21  ;;  %v1242_v41 = vadd.f32 %v1241_v49, %v1240_v59  ;;  %v1321_v32 = vpop.f32.mrb[37].mxu1 }
 0x22a   :  { %v1322_v26 = vadd.f32 %v1321_v32, %v1320_v56 }
 0x22b   :  { %v954_v31 = vadd.f32 %v1242_v41, %v2271_v61 }
 0x22d   :  { %v1099_v60 = vadd.f32 %v1322_v26, %v954_v31  ;;  %v1243_v19 = vpop.f32.mrb[38].mxu0 }
 0x22e   :  { %v1323_v6 = vpop.f32.mrb[38].mxu1  ;;  %v1244_v8 = vpop.f32.mrb[39].mxu0 }
 0x22f   :  { %1169 = vst [vmem:[#allocation8 + $0x10] sm:$0xff] %v1099_v60  ;;  %v1245_v46 = vadd.f32 %v1244_v8, %v1243_v19  ;;  %v1324_v55 = vpop.f32.mrb[39].mxu1 }
 0x230   :  { %v1325_v4 = vadd.f32 %v1324_v55, %v1323_v6 }
 0x231   :  { %v959_v1 = vadd.f32 %v1245_v46, %v2271_v61 }
 0x233   :  { %v1104_v35 = vadd.f32 %v1325_v4, %v959_v1  ;;  %v1246_v48 = vpop.f32.mrb[40].mxu0 }
 0x234   :  { %v1326_v53 = vpop.f32.mrb[40].mxu1  ;;  %v1247_v43 = vpop.f32.mrb[41].mxu0 }
 0x235   :  { %1170 = vst [vmem:[#allocation8 + $0x18] sm:$0xff] %v1104_v35  ;;  %v1248_v45 = vadd.f32 %v1247_v43, %v1246_v48  ;;  %v1327_v52 = vpop.f32.mrb[41].mxu1 }
 0x236   :  { %v1328_v7 = vadd.f32 %v1327_v52, %v1326_v53 }
 0x237   :  { %v964_v25 = vadd.f32 %v1248_v45, %v2271_v61 }
 0x239   :  { %v1109_v11 = vadd.f32 %v1328_v7, %v964_v25  ;;  %v1249_v3 = vpop.f32.mrb[42].mxu0 }
 0x23a   :  { %v1329_v51 = vpop.f32.mrb[42].mxu1  ;;  %v1250_v27 = vpop.f32.mrb[43].mxu0 }
 0x23b   :  { %1171 = vst [vmem:[#allocation8 + $0x20] sm:$0xff] %v1109_v11  ;;  %v1251_v13 = vadd.f32 %v1250_v27, %v1249_v3  ;;  %v1330_v29 = vpop.f32.mrb[43].mxu1 }
 0x23c   :  { %v1331_v30 = vadd.f32 %v1330_v29, %v1329_v51 }
 0x23d   :  { %v969_v28 = vadd.f32 %v1251_v13, %v2271_v61 }
 0x23e   :  { %v1252_v33 = vpop.f32.mrb[44].mxu0 }
 0x23f   :  { %v1114_v58 = vadd.f32 %v1331_v30, %v969_v28  ;;  %v1253_v15 = vpop.f32.mrb[45].mxu0 }
 0x240   :  { %v1332_v63 = vpop.f32.mrb[44].mxu1  ;;  %v1254_v17 = vadd.f32 %v1253_v15, %v1252_v33 }
 0x241   :  { %1172 = vst [vmem:[#allocation8 + $0x28] sm:$0xff] %v1114_v58  ;;  %v1333_v20 = vpop.f32.mrb[45].mxu1 }
 0x242   :  { %v1334_v14 = vadd.f32 %v1333_v20, %v1332_v63  ;;  %v974_v38 = vadd.f32 %v1254_v17, %v2271_v61 }
 0x244   :  { %v1119_v54 = vadd.f32 %v1334_v14, %v974_v38 }
 0x245   :  { %v1255_v50 = vpop.f32.mrb[46].mxu0 }
 0x246   :  { %v1335_v5 = vpop.f32.mrb[46].mxu1  ;;  %v1256_v37 = vpop.f32.mrb[47].mxu0  ;;  %1173 = vst [vmem:[#allocation8 + $0x30] sm:$0xff] %v1119_v54 }
 0x247   :  { %v1257_v9 = vadd.f32 %v1256_v37, %v1255_v50  ;;  %v1336_v44 = vpop.f32.mrb[47].mxu1 }
 0x248   :  { %v1337_v42 = vadd.f32 %v1336_v44, %v1335_v5 }
 0x249   :  { %v979_v22 = vadd.f32 %v1257_v9, %v2271_v61 }
 0x24b   :  { %v1124_v2 = vadd.f32 %v1337_v42, %v979_v22  ;;  %v1258_v40 = vpop.f32.mrb[48].mxu0 }
 0x24c   :  { %v1338_v23 = vpop.f32.mrb[48].mxu1  ;;  %v1259_v24 = vpop.f32.mrb[49].mxu0 }
 0x24d   :  { %1174 = vst [vmem:[#allocation8 + $0x38] sm:$0xff] %v1124_v2  ;;  %v1260_v47 = vadd.f32 %v1259_v24, %v1258_v40  ;;  %v1339_v57 = vpop.f32.mrb[49].mxu1 }
 0x24e   :  { %v1340_v12 = vadd.f32 %v1339_v57, %v1338_v23 }
 0x24f   :  { %v984_v62 = vadd.f32 %v1260_v47, %v2271_v61 }
 0x251   :  { %v1129_v16 = vadd.f32 %v1340_v12, %v984_v62  ;;  %v1261_v34 = vpop.f32.mrb[50].mxu0 }
 0x252   :  { %v1341_v39 = vpop.f32.mrb[50].mxu1  ;;  %v1262_v18 = vpop.f32.mrb[51].mxu0 }
 0x253   :  { %1175 = vst [vmem:[#allocation8 + $0x40] sm:$0xff] %v1129_v16  ;;  %v1263_v10 = vadd.f32 %v1262_v18, %v1261_v34  ;;  %v1342_v0 = vpop.f32.mrb[51].mxu1 }
 0x254   :  { %v1343_v36 = vadd.f32 %v1342_v0, %v1341_v39 }
 0x255   :  { %v989_v21 = vadd.f32 %v1263_v10, %v2271_v61 }
 0x257   :  { %v1134_v59 = vadd.f32 %v1343_v36, %v989_v21  ;;  %v1264_v56 = vpop.f32.mrb[52].mxu0 }
 0x258   :  { %v1344_v49 = vpop.f32.mrb[52].mxu1  ;;  %v1265_v41 = vpop.f32.mrb[53].mxu0 }
 0x259   :  { %1176 = vst [vmem:[#allocation8 + $0x48] sm:$0xff] %v1134_v59  ;;  %v1266_v32 = vadd.f32 %v1265_v41, %v1264_v56  ;;  %v1345_v26 = vpop.f32.mrb[53].mxu1 }
 0x25a   :  { %v1346_v31 = vadd.f32 %v1345_v26, %v1344_v49 }
 0x25b   :  { %v994_v60 = vadd.f32 %v1266_v32, %v2271_v61  ;;  %v1267_v19 = vpop.f32.mrb[54].mxu0 }
 0x25c   :  { %v1347_v6 = vpop.f32.mrb[54].mxu1  ;;  %v1268_v8 = vpop.f32.mrb[55].mxu0 }
 0x25d   :  { %v1139_v46 = vadd.f32 %v1346_v31, %v994_v60  ;;  %v1269_v55 = vadd.f32 %v1268_v8, %v1267_v19  ;;  %v1348_v4 = vpop.f32.mrb[55].mxu1 }
 0x25e   :  { %v1349_v1 = vadd.f32 %v1348_v4, %v1347_v6 }
 0x25f   :  { %1177 = vst [vmem:[#allocation8 + $0x50] sm:$0xff] %v1139_v46  ;;  %v999_v35 = vadd.f32 %v1269_v55, %v2271_v61  ;;  %v1270_v48 = vpop.f32.mrb[56].mxu0 }
 0x260   :  { %v1350_v53 = vpop.f32.mrb[56].mxu1  ;;  %v1271_v43 = vpop.f32.mrb[57].mxu0 }
 0x261   :  { %v1144_v45 = vadd.f32 %v1349_v1, %v999_v35  ;;  %v1272_v52 = vadd.f32 %v1271_v43, %v1270_v48  ;;  %v1351_v7 = vpop.f32.mrb[57].mxu1 }
 0x262   :  { %v1352_v25 = vadd.f32 %v1351_v7, %v1350_v53 }
 0x263   :  { %1178 = vst [vmem:[#allocation8 + $0x58] sm:$0xff] %v1144_v45  ;;  %v1004_v11 = vadd.f32 %v1272_v52, %v2271_v61  ;;  %v1273_v3 = vpop.f32.mrb[58].mxu0 }
 0x264   :  { %v1353_v51 = vpop.f32.mrb[58].mxu1  ;;  %v1274_v27 = vpop.f32.mrb[59].mxu0 }
 0x265   :  { %v1149_v13 = vadd.f32 %v1352_v25, %v1004_v11  ;;  %v1275_v29 = vadd.f32 %v1274_v27, %v1273_v3  ;;  %v1354_v30 = vpop.f32.mrb[59].mxu1 }
 0x266   :  { %v1355_v28 = vadd.f32 %v1354_v30, %v1353_v51 }
 0x267   :  { %1179 = vst [vmem:[#allocation8 + $0x60] sm:$0xff] %v1149_v13  ;;  %v1009_v58 = vadd.f32 %v1275_v29, %v2271_v61  ;;  %v1276_v33 = vpop.f32.mrb[60].mxu0 }
 0x268   :  { %v1356_v63 = vpop.f32.mrb[60].mxu1  ;;  %v1277_v15 = vpop.f32.mrb[61].mxu0 }
 0x269   :  { %v1154_v17 = vadd.f32 %v1355_v28, %v1009_v58  ;;  %v1278_v20 = vadd.f32 %v1277_v15, %v1276_v33  ;;  %v1357_v14 = vpop.f32.mrb[61].mxu1 }
 0x26a   :  { %v1358_v38 = vadd.f32 %v1357_v14, %v1356_v63 }
 0x26b   :  { %1180 = vst [vmem:[#allocation8 + $0x68] sm:$0xff] %v1154_v17  ;;  %v1014_v54 = vadd.f32 %v1278_v20, %v2271_v61  ;;  %v1279_v50 = vpop.f32.mrb[62].mxu0 }
 0x26c   :  { %v1359_v5 = vpop.f32.mrb[62].mxu1  ;;  %v1280_v37 = vpop.f32.mrb[63].mxu0 }
 0x26d   :  { %v1159_v9 = vadd.f32 %v1358_v38, %v1014_v54  ;;  %v1281_v44 = vadd.f32 %v1280_v37, %v1279_v50  ;;  %v1360_v42 = vpop.f32.mrb[63].mxu1 }
 0x26e   :  { %v1361_v22 = vadd.f32 %v1360_v42, %v1359_v5 }
 0x26f   :  { %1181 = vst [vmem:[#allocation8 + $0x70] sm:$0xff] %v1159_v9  ;;  %v1019_v2 = vadd.f32 %v1281_v44, %v2271_v61 }
 0x271   :  { %v1164_v40 = vadd.f32 %v1361_v22, %v1019_v2 }
 0x273   :  { %1182 = vst [vmem:[#allocation8 + $0x78] sm:$0xff] %v1164_v40 }
 0x274   :  { %1704 = shalt.err (!%p1701_p0)
}
 0x275   :  { %s1705_s12 = scalar_lea.hbm %s2309_s5, 2048 }
 0x276   :  { %p1706_p1 = scmp.ne.s32.totalorder %s2309_s5, %s1705_s12  ;;  %p1709_p2 = scmp.lt.u32.totalorder %s1705_s12, %s2309_s5 }
 0x278   :  { %p1711_p3 = pnand %p1709_p2, %p1706_p1 }
 0x27a   :  { %1714 = shalt.err (!%p1711_p3)
}
 0x27b   :  { %1194 = dma.vmem_to_hbm [thread:$0]  %s1189_s8, 2048, %s2309_s5, [#allocation4], %s1725_s1, %s1725_s1, %s1726_s17  }
 0x27c   :  { %1719 = dma.done.wait [#allocation4], 2048  }
 0x27d   :  { %1720 = vsyncadd [#allocation4], 4294965248 }
 0x27e   :  { %1198 = vsyncpa [#allocation3], 1 }
 0x27f   :  { %1199 = vsyncpa [#allocation6], 1 }
 0x280   :  { %1200 = vsyncpa [#allocation4], 1 }

</bundles_post_ra>
